<compile_context>
chip_gen: v7x
topology: tpu7x:2x2x1
jax: 0.10.0
libtpu: 0.0.40
codegen_flags: <defaults>
</compile_context>

<pallas_src>
import functools

import jax
import jax.numpy as jnp
from jax.experimental import pallas as pl
from jax.experimental.pallas import tpu as pltpu


def _round_up(x, m):
    return (x + m - 1) // m * m


# --------------------------------------------------------------------------- #
# Fused kernel: GRU recurrence over a block of tt time steps + head epilogue.
#   xp_ref  : (tt, 3, tb, H)  pre-projected inputs, gate-major (r, z, n)
#   whh_ref : (3, H, H)       per-gate hidden weights (lane-aligned)
#   bhn_ref : (1, H)          b_hn (stays inside r*(...) per PyTorch GRU)
#   w2/b2   : linear2, wo/bo : out_layer padded to C_pad lanes
#   out_ref : (tt, tb, C_pad) logits / softmax, lane-dense store
#   h_ref   : (tb, H)         persistent hidden state (VMEM scratch)
#   hblk_ref: (tt*tb, H)      per-block hidden states for the batched head
# --------------------------------------------------------------------------- #
def _gru_head_kernel(xp_ref, whh_ref, bhn_ref, w2_ref, b2_ref, wo_ref, bo_ref,
                     out_ref, h_ref, hblk_ref, *, tt, tb, hidden, class_num,
                     apply_softmax):
    t = pl.program_id(1)

    @pl.when(t == 0)
    def _():
        h_ref[...] = jnp.zeros_like(h_ref)     # GRU h0 = 0 (PyTorch default)

    # Loop invariants hoisted out of the unrolled recurrence.
    whh_r = whh_ref[0]                         # (H, H), each gate lane-aligned
    whh_z = whh_ref[1]
    whh_n = whh_ref[2]
    bhn_b = jnp.broadcast_to(bhn_ref[...], (tb, hidden))   # hoisted broadcast

    def step(j, h):
        xp = xp_ref[j]                         # (3, tb, H): x@W_ih + fused biases
        hr = jnp.dot(h, whh_r, preferred_element_type=jnp.float32)
        hz = jnp.dot(h, whh_z, preferred_element_type=jnp.float32)
        hn = jnp.dot(h, whh_n, preferred_element_type=jnp.float32)
        r = jax.nn.sigmoid(xp[0] + hr)
        z = jax.nn.sigmoid(xp[1] + hz)
        n = jnp.tanh(xp[2] + r * (hn + bhn_b))
        h_new = n + z * (h - n)                # == (1-z)*n + z*h, one fewer mul
        hblk_ref[pl.ds(j * tb, tb), :] = h_new
        return h_new

    # unrolled so the LLO scheduler sees the whole block of tt serial steps
    h_ref[...] = jax.lax.fori_loop(0, tt, step, h_ref[...], unroll=True)

    # ---- fused head epilogue (linear2 -> relu -> out_layer [-> softmax]) ----
    # Batched over tt*tb rows straight from VMEM: no hidden_seq HBM round-trip.
    hblk = hblk_ref[...]                       # (tt*tb, H)
    inter = jnp.maximum(
        jnp.dot(hblk, w2_ref[...], preferred_element_type=jnp.float32)
        + b2_ref[...], 0.0)
    # TODO(synk): F.dropout(p=0.5, training=True) is stochastic; applied as identity.
    y = jnp.dot(inter, wo_ref[...], preferred_element_type=jnp.float32) + bo_ref[...]
    if apply_softmax:
        col = jax.lax.broadcasted_iota(jnp.int32, y.shape, 1)
        y = jnp.where(col < class_num, y, jnp.float32(-1e30))
        y = jax.nn.softmax(y, axis=-1)         # padded lanes -> 0 probability
    out_ref[...] = y.reshape(tt, tb, -1).astype(out_ref.dtype)


# --------------------------------------------------------------------------- #
# Wrapper
# --------------------------------------------------------------------------- #
def token_labeling_forward(x_source, params, apply_softmax=False, *, tt=None, tb=None):
    """Pallas forward for TokenLabelingModel.  x_source: int32 (B, S) -> (B, S, C)."""
    emb = params["embedding"]                     # (V, E), row 0 = padding (zeros)
    B, S = x_source.shape
    H = params["whh"].shape[-1]
    C = params["wo"].shape[1]

    # ---- tiling --------------------------------------------------------------
    B_pad = _round_up(B, 8)                       # sublane multiple
    if tb is None:
        # v7x: give the second TensorCore its own batch block when possible.
        tb = B_pad // 2 if (B_pad >= 16 and (B_pad // 2) % 8 == 0) else B_pad
    B_pad = _round_up(B_pad, tb)
    if tt is None:
        tt = 16                                   # amortize ~0.35us/grid-step
    tt = max(1, min(tt, _round_up(S, 8)))         # don't over-pad tiny sequences
    S_pad = _round_up(S, tt)

    # ---- XLA glue: embedding gather + hoisted input projection ----------------
    x_src = jnp.zeros((B_pad, S_pad), x_source.dtype).at[:B, :S].set(x_source)
    x_emb = emb[x_src.T]                          # (S_pad, B_pad, E), sequence-major
    # Gate-major (S, 3, B, H): every gate the kernel reads starts at lane 0.
    x_proj = (jnp.einsum("sbe,egh->sgbh", x_emb, params["w_ih"])
              + params["b_rzn"][None]).astype(jnp.float32)

    # ---- lane-dense padded head weights ---------------------------------------
    C_pad = _round_up(C, 128)
    wo_pad = jnp.zeros((H, C_pad), jnp.float32).at[:, :C].set(params["wo"])
    bo_pad = jnp.zeros((1, C_pad), jnp.float32).at[:, :C].set(params["bo"])

    grid = (B_pad // tb, S_pad // tt)
    logits = pl.pallas_call(
        functools.partial(_gru_head_kernel, tt=tt, tb=tb, hidden=H,
                          class_num=C, apply_softmax=apply_softmax),
        out_shape=jax.ShapeDtypeStruct((S_pad, B_pad, C_pad), jnp.float32),
        grid=grid,
        in_specs=[
            pl.BlockSpec((tt, 3, tb, H), lambda b, t: (t, 0, b, 0)),   # x_proj
            pl.BlockSpec((3, H, H), lambda b, t: (0, 0, 0)),           # whh
            pl.BlockSpec((1, H), lambda b, t: (0, 0)),                 # bhn
            pl.BlockSpec((H, H), lambda b, t: (0, 0)),                 # w2
            pl.BlockSpec((1, H), lambda b, t: (0, 0)),                 # b2
            pl.BlockSpec((H, C_pad), lambda b, t: (0, 0)),             # wo_pad
            pl.BlockSpec((1, C_pad), lambda b, t: (0, 0)),             # bo_pad
        ],
        out_specs=pl.BlockSpec((tt, tb, C_pad), lambda b, t: (t, b, 0)),
        scratch_shapes=[pltpu.VMEM((tb, H), jnp.float32),              # h state
                        pltpu.VMEM((tt * tb, H), jnp.float32)],        # h block
        compiler_params=pltpu.CompilerParams(
            dimension_semantics=("parallel", "arbitrary")),
    )(x_proj, params["whh"], params["bhn"], params["w2"], params["b2"],
      wo_pad, bo_pad)

    y = logits[:S, :B, :C]                        # strip time/batch/class padding
    return jnp.transpose(y, (1, 0, 2))            # batch_first (B, S, C)


# --------------------------------------------------------------------------- #
# Parameter construction (fused, gate-major layout) and pure-JAX reference
# --------------------------------------------------------------------------- #
def init_params(key, num_embeddings, embedding_size, rnn_hidden_size, class_num):
    E, H, C = embedding_size, rnn_hidden_size, class_num
    keys = jax.random.split(key, 11)
    s = 1.0 / float(H) ** 0.5

    emb = jax.random.normal(keys[0], (num_embeddings, E), jnp.float32)
    emb = emb.at[0].set(0.0)                      # padding_idx=0 -> zero row

    w_ih = jax.random.uniform(keys[1], (3 * H, E), jnp.float32, -s, s)   # (r,z,n) stacked
    w_hh = jax.random.uniform(keys[2], (3 * H, H), jnp.float32, -s, s)
    b_ih = jax.random.uniform(keys[3], (3 * H,), jnp.float32, -s, s)
    b_hh = jax.random.uniform(keys[4], (3 * H,), jnp.float32, -s, s)

    # gate-major fused layouts for right-multiplication
    w_ih_f = w_ih.T.reshape(E, 3, H)              # (E, 3, H)
    w_hh_f = w_hh.reshape(3, H, H).transpose(0, 2, 1)   # (3, H_in, H_out)
    b_ih3, b_hh3 = b_ih.reshape(3, H), b_hh.reshape(3, H)
    b_rzn = jnp.stack([b_ih3[0] + b_hh3[0],       # b_ir + b_hr
                       b_ih3[1] + b_hh3[1],       # b_iz + b_hz
                       b_ih3[2]], axis=0).reshape(3, 1, H)   # b_in only
    bhn = b_hh3[2].reshape(1, H)                  # b_hn stays inside r*(...)

    # linear1 exists in the module but its output is discarded by forward();
    # parameters kept for shape fidelity only.
    w1 = jax.random.uniform(keys[5], (H, H), jnp.float32, -s, s).T
    b1 = jax.random.uniform(keys[6], (H,), jnp.float32, -s, s).reshape(1, H)
    w2 = jax.random.uniform(keys[7], (H, H), jnp.float32, -s, s).T
    b2 = jax.random.uniform(keys[8], (H,), jnp.float32, -s, s).reshape(1, H)
    wo = jax.random.uniform(keys[9], (C, H), jnp.float32, -s, s).T        # (H, C)
    bo = jax.random.uniform(keys[10], (C,), jnp.float32, -s, s).reshape(1, C)

    return dict(embedding=emb, w_ih=w_ih_f, b_rzn=b_rzn, whh=w_hh_f, bhn=bhn,
                w1=w1, b1=b1, w2=w2, b2=b2, wo=wo, bo=bo)


def reference_forward(x_source, params, apply_softmax=False):
    """Pure-JAX reference (mirrors the PyTorch forward; dropout as identity)."""
    x_emb = params["embedding"][x_source]         # (B, S, E)
    B, S, _ = x_emb.shape
    H = params["whh"].shape[-1]
    h = jnp.zeros((B, H), jnp.float32)
    outs = []
    for t in range(S):
        xp = jnp.einsum("be,egh->gbh", x_emb[:, t, :], params["w_ih"]) + params["b_rzn"]
        hh = jnp.einsum("bh,ghk->gbk", h, params["whh"])
        r = jax.nn.sigmoid(xp[0] + hh[0])
        z = jax.nn.sigmoid(xp[1] + hh[1])
        n = jnp.tanh(xp[2] + r * (hh[2] + params["bhn"]))
        h = (1.0 - z) * n + z * h
        inter = jnp.maximum(h @ params["w2"] + params["b2"], 0.0)
        y = inter @ params["wo"] + params["bo"]
        if apply_softmax:
            y = jax.nn.softmax(y, axis=-1)
        outs.append(y)
    return jnp.stack(outs, axis=1)


if __name__ == "__main__":
    num_embeddings = 50
    embedding_size = 32
    rnn_hidden_size = 32
    class_num = 8
    batch, seq = 2, 8

    key = jax.random.PRNGKey(0)
    k_params, k_x = jax.random.split(key)
    params = init_params(k_params, num_embeddings, embedding_size,
                         rnn_hidden_size, class_num)
    x_source = jax.random.randint(k_x, (batch, seq), 0, num_embeddings,
                                  dtype=jnp.int32)

    for apply_softmax in (False, True):
        y = token_labeling_forward(x_source, params, apply_softmax=apply_softmax)
        y = jax.block_until_ready(y)
        y_ref = reference_forward(x_source, params, apply_softmax=apply_softmax)
        assert y.shape == (batch, seq, class_num)
        assert jnp.allclose(y, y_ref, atol=1e-5, rtol=1e-5), (
            "max abs diff = %e" % float(jnp.max(jnp.abs(y - y_ref))))

    print("KERNEL_OK")
</pallas_src>

<mosaic_0001>
module attributes {stable_mosaic.version = 11 : i64} {
  func.func @_gru_head_kernel(%arg0: i32, %arg1: i32, %arg2: memref<8x3x8x32xf32, #tpu.memory_space<vmem>>, %arg3: memref<3x32x32xf32, #tpu.memory_space<vmem>>, %arg4: memref<1x32xf32, #tpu.memory_space<vmem>>, %arg5: memref<32x32xf32, #tpu.memory_space<vmem>>, %arg6: memref<1x32xf32, #tpu.memory_space<vmem>>, %arg7: memref<32x128xf32, #tpu.memory_space<vmem>>, %arg8: memref<1x128xf32, #tpu.memory_space<vmem>>, %arg9: memref<8x8x128xf32, #tpu.memory_space<vmem>>, %arg10: memref<8x32xf32, #tpu.memory_space<vmem>>, %arg11: memref<64x32xf32, #tpu.memory_space<vmem>>) attributes {dimension_semantics = [#tpu.dimension_semantics<parallel>, #tpu.dimension_semantics<arbitrary>], iteration_bounds = array<i64: 1, 1>, scalar_prefetch = 0 : i64, scratch_operands = 2 : i64, tpu.core_type = #tpu.core_type<tc>, window_params = [{transform_indices = @transform_0, window_bounds = array<i64: 8, 3, 8, 32>}, {pipeline_mode = #tpu.pipeline_mode<synchronous>, transform_indices = @transform_1, window_bounds = array<i64: 3, 32, 32>}, {pipeline_mode = #tpu.pipeline_mode<synchronous>, transform_indices = @transform_2, window_bounds = array<i64: 1, 32>}, {pipeline_mode = #tpu.pipeline_mode<synchronous>, transform_indices = @transform_3, window_bounds = array<i64: 32, 32>}, {pipeline_mode = #tpu.pipeline_mode<synchronous>, transform_indices = @transform_4, window_bounds = array<i64: 1, 32>}, {pipeline_mode = #tpu.pipeline_mode<synchronous>, transform_indices = @transform_5, window_bounds = array<i64: 32, 128>}, {pipeline_mode = #tpu.pipeline_mode<synchronous>, transform_indices = @transform_6, window_bounds = array<i64: 1, 128>}, {transform_indices = @transform_7, window_bounds = array<i64: 8, 8, 128>}]} {
    %c0_i32 = arith.constant 0 : i32
    %0 = arith.cmpi eq, %arg1, %c0_i32 : i32
    %1 = arith.extui %0 : i1 to i32
    %c0_i32_0 = arith.constant 0 : i32
    %2 = arith.cmpi ne, %1, %c0_i32_0 : i32
    scf.if %2 {
      %cst_109 = arith.constant 0.000000e+00 : f32
      %301 = vector.broadcast %cst_109 : f32 to vector<8x32xf32>
      %c0_110 = arith.constant 0 : index
      %c0_111 = arith.constant 0 : index
      %302 = vector.load %arg10[%c0_110, %c0_111] : memref<8x32xf32, #tpu.memory_space<vmem>>, vector<8x32xf32>
      tpu.vector_store %arg10[%c0_110, %c0_111], %301 {strides = array<i32>} : memref<8x32xf32, #tpu.memory_space<vmem>>, vector<8x32xf32>,
    } else {
    }
    %c0 = arith.constant 0 : index
    %c0_1 = arith.constant 0 : index
    %c0_2 = arith.constant 0 : index
    %3 = vector.load %arg3[%c0, %c0_1, %c0_2] : memref<3x32x32xf32, #tpu.memory_space<vmem>>, vector<1x32x32xf32>
    %4 = vector.shape_cast %3 : vector<1x32x32xf32> to vector<32x32xf32>
    %c1 = arith.constant 1 : index
    %c0_3 = arith.constant 0 : index
    %c0_4 = arith.constant 0 : index
    %5 = vector.load %arg3[%c1, %c0_3, %c0_4] : memref<3x32x32xf32, #tpu.memory_space<vmem>>, vector<1x32x32xf32>
    %6 = vector.shape_cast %5 : vector<1x32x32xf32> to vector<32x32xf32>
    %c2 = arith.constant 2 : index
    %c0_5 = arith.constant 0 : index
    %c0_6 = arith.constant 0 : index
    %7 = vector.load %arg3[%c2, %c0_5, %c0_6] : memref<3x32x32xf32, #tpu.memory_space<vmem>>, vector<1x32x32xf32>
    %8 = vector.shape_cast %7 : vector<1x32x32xf32> to vector<32x32xf32>
    %c0_7 = arith.constant 0 : index
    %c0_8 = arith.constant 0 : index
    %9 = vector.load %arg4[%c0_7, %c0_8] : memref<1x32xf32, #tpu.memory_space<vmem>>, vector<1x32xf32>
    %10 = vector.shape_cast %9 : vector<1x32xf32> to vector<1x32xf32>
    %11 = vector.broadcast %10 : vector<1x32xf32> to vector<8x32xf32>
    %c0_9 = arith.constant 0 : index
    %c0_10 = arith.constant 0 : index
    %12 = vector.load %arg10[%c0_9, %c0_10] : memref<8x32xf32, #tpu.memory_space<vmem>>, vector<8x32xf32>
    %c0_i32_11 = arith.constant 0 : i32
    %13 = arith.index_cast %c0_i32_11 : i32 to index
    %c0_12 = arith.constant 0 : index
    %c0_13 = arith.constant 0 : index
    %c0_14 = arith.constant 0 : index
    %14 = vector.load %arg2[%13, %c0_12, %c0_13, %c0_14] : memref<8x3x8x32xf32, #tpu.memory_space<vmem>>, vector<1x3x8x32xf32>
    %15 = vector.shape_cast %14 : vector<1x3x8x32xf32> to vector<3x8x32xf32>
    %cst = arith.constant dense<0.000000e+00> : vector<8x32xf32>
    %16 = tpu.matmul %12, %4, %cst {dimension_numbers = #tpu.dot_dimension_numbers<[1], [0], [0], [1], [0, 0, 1, 1], [], []>} : vector<8x32xf32>, vector<32x32xf32>, vector<8x32xf32> -> vector<8x32xf32>
    %cst_15 = arith.constant dense<0.000000e+00> : vector<8x32xf32>
    %17 = tpu.matmul %12, %6, %cst_15 {dimension_numbers = #tpu.dot_dimension_numbers<[1], [0], [0], [1], [0, 0, 1, 1], [], []>} : vector<8x32xf32>, vector<32x32xf32>, vector<8x32xf32> -> vector<8x32xf32>
    %cst_16 = arith.constant dense<0.000000e+00> : vector<8x32xf32>
    %18 = tpu.matmul %12, %8, %cst_16 {dimension_numbers = #tpu.dot_dimension_numbers<[1], [0], [0], [1], [0, 0, 1, 1], [], []>} : vector<8x32xf32>, vector<32x32xf32>, vector<8x32xf32> -> vector<8x32xf32>
    %19 = vector.extract_strided_slice %15 {offsets = [0, 0, 0], sizes = [1, 8, 32], strides = [1, 1, 1]} : vector<3x8x32xf32> to vector<1x8x32xf32>
    %20 = vector.shape_cast %19 : vector<1x8x32xf32> to vector<8x32xf32>
    %21 = arith.addf %20, %16 : vector<8x32xf32>
    %22 = arith.negf %21 : vector<8x32xf32>
    %23 = math.exp %22 : vector<8x32xf32>
    %cst_17 = arith.constant 1.000000e+00 : f32
    %24 = vector.broadcast %cst_17 : f32 to vector<8x32xf32>
    %25 = arith.addf %24, %23 : vector<8x32xf32>
    %26 = arith.divf %24, %25 : vector<8x32xf32>
    %27 = vector.extract_strided_slice %15 {offsets = [1, 0, 0], sizes = [1, 8, 32], strides = [1, 1, 1]} : vector<3x8x32xf32> to vector<1x8x32xf32>
    %28 = vector.shape_cast %27 : vector<1x8x32xf32> to vector<8x32xf32>
    %29 = arith.addf %28, %17 : vector<8x32xf32>
    %30 = arith.negf %29 : vector<8x32xf32>
    %31 = math.exp %30 : vector<8x32xf32>
    %cst_18 = arith.constant 1.000000e+00 : f32
    %32 = vector.broadcast %cst_18 : f32 to vector<8x32xf32>
    %33 = arith.addf %32, %31 : vector<8x32xf32>
    %34 = arith.divf %32, %33 : vector<8x32xf32>
    %35 = vector.extract_strided_slice %15 {offsets = [2, 0, 0], sizes = [1, 8, 32], strides = [1, 1, 1]} : vector<3x8x32xf32> to vector<1x8x32xf32>
    %36 = vector.shape_cast %35 : vector<1x8x32xf32> to vector<8x32xf32>
    %37 = arith.addf %18, %11 : vector<8x32xf32>
    %38 = arith.mulf %26, %37 : vector<8x32xf32>
    %39 = arith.addf %36, %38 : vector<8x32xf32>
    %40 = math.tanh %39 : vector<8x32xf32>
    %41 = arith.subf %12, %40 : vector<8x32xf32>
    %42 = arith.mulf %34, %41 : vector<8x32xf32>
    %43 = arith.addf %40, %42 : vector<8x32xf32>
    %c8_i32 = arith.constant 8 : i32
    %44 = arith.muli %c0_i32_11, %c8_i32 : i32
    %45 = arith.index_cast %44 : i32 to index
    %c0_19 = arith.constant 0 : index
    %46 = vector.load %arg11[%45, %c0_19] : memref<64x32xf32, #tpu.memory_space<vmem>>, vector<8x32xf32>
    tpu.vector_store %arg11[%45, %c0_19], %43 {strides = array<i32>} : memref<64x32xf32, #tpu.memory_space<vmem>>, vector<8x32xf32>,
    %c1_i32 = arith.constant 1 : i32
    %47 = arith.index_cast %c1_i32 : i32 to index
    %c0_20 = arith.constant 0 : index
    %c0_21 = arith.constant 0 : index
    %c0_22 = arith.constant 0 : index
    %48 = vector.load %arg2[%47, %c0_20, %c0_21, %c0_22] : memref<8x3x8x32xf32, #tpu.memory_space<vmem>>, vector<1x3x8x32xf32>
    %49 = vector.shape_cast %48 : vector<1x3x8x32xf32> to vector<3x8x32xf32>
    %cst_23 = arith.constant dense<0.000000e+00> : vector<8x32xf32>
    %50 = tpu.matmul %43, %4, %cst_23 {dimension_numbers = #tpu.dot_dimension_numbers<[1], [0], [0], [1], [0, 0, 1, 1], [], []>} : vector<8x32xf32>, vector<32x32xf32>, vector<8x32xf32> -> vector<8x32xf32>
    %cst_24 = arith.constant dense<0.000000e+00> : vector<8x32xf32>
    %51 = tpu.matmul %43, %6, %cst_24 {dimension_numbers = #tpu.dot_dimension_numbers<[1], [0], [0], [1], [0, 0, 1, 1], [], []>} : vector<8x32xf32>, vector<32x32xf32>, vector<8x32xf32> -> vector<8x32xf32>
    %cst_25 = arith.constant dense<0.000000e+00> : vector<8x32xf32>
    %52 = tpu.matmul %43, %8, %cst_25 {dimension_numbers = #tpu.dot_dimension_numbers<[1], [0], [0], [1], [0, 0, 1, 1], [], []>} : vector<8x32xf32>, vector<32x32xf32>, vector<8x32xf32> -> vector<8x32xf32>
    %53 = vector.extract_strided_slice %49 {offsets = [0, 0, 0], sizes = [1, 8, 32], strides = [1, 1, 1]} : vector<3x8x32xf32> to vector<1x8x32xf32>
    %54 = vector.shape_cast %53 : vector<1x8x32xf32> to vector<8x32xf32>
    %55 = arith.addf %54, %50 : vector<8x32xf32>
    %56 = arith.negf %55 : vector<8x32xf32>
    %57 = math.exp %56 : vector<8x32xf32>
    %cst_26 = arith.constant 1.000000e+00 : f32
    %58 = vector.broadcast %cst_26 : f32 to vector<8x32xf32>
    %59 = arith.addf %58, %57 : vector<8x32xf32>
    %60 = arith.divf %58, %59 : vector<8x32xf32>
    %61 = vector.extract_strided_slice %49 {offsets = [1, 0, 0], sizes = [1, 8, 32], strides = [1, 1, 1]} : vector<3x8x32xf32> to vector<1x8x32xf32>
    %62 = vector.shape_cast %61 : vector<1x8x32xf32> to vector<8x32xf32>
    %63 = arith.addf %62, %51 : vector<8x32xf32>
    %64 = arith.negf %63 : vector<8x32xf32>
    %65 = math.exp %64 : vector<8x32xf32>
    %cst_27 = arith.constant 1.000000e+00 : f32
    %66 = vector.broadcast %cst_27 : f32 to vector<8x32xf32>
    %67 = arith.addf %66, %65 : vector<8x32xf32>
    %68 = arith.divf %66, %67 : vector<8x32xf32>
    %69 = vector.extract_strided_slice %49 {offsets = [2, 0, 0], sizes = [1, 8, 32], strides = [1, 1, 1]} : vector<3x8x32xf32> to vector<1x8x32xf32>
    %70 = vector.shape_cast %69 : vector<1x8x32xf32> to vector<8x32xf32>
    %71 = arith.addf %52, %11 : vector<8x32xf32>
    %72 = arith.mulf %60, %71 : vector<8x32xf32>
    %73 = arith.addf %70, %72 : vector<8x32xf32>
    %74 = math.tanh %73 : vector<8x32xf32>
    %75 = arith.subf %43, %74 : vector<8x32xf32>
    %76 = arith.mulf %68, %75 : vector<8x32xf32>
    %77 = arith.addf %74, %76 : vector<8x32xf32>
    %c8_i32_28 = arith.constant 8 : i32
    %78 = arith.muli %c1_i32, %c8_i32_28 : i32
    %79 = arith.index_cast %78 : i32 to index
    %c0_29 = arith.constant 0 : index
    %80 = vector.load %arg11[%79, %c0_29] : memref<64x32xf32, #tpu.memory_space<vmem>>, vector<8x32xf32>
    tpu.vector_store %arg11[%79, %c0_29], %77 {strides = array<i32>} : memref<64x32xf32, #tpu.memory_space<vmem>>, vector<8x32xf32>,
    %c2_i32 = arith.constant 2 : i32
    %81 = arith.index_cast %c2_i32 : i32 to index
    %c0_30 = arith.constant 0 : index
    %c0_31 = arith.constant 0 : index
    %c0_32 = arith.constant 0 : index
    %82 = vector.load %arg2[%81, %c0_30, %c0_31, %c0_32] : memref<8x3x8x32xf32, #tpu.memory_space<vmem>>, vector<1x3x8x32xf32>
    %83 = vector.shape_cast %82 : vector<1x3x8x32xf32> to vector<3x8x32xf32>
    %cst_33 = arith.constant dense<0.000000e+00> : vector<8x32xf32>
    %84 = tpu.matmul %77, %4, %cst_33 {dimension_numbers = #tpu.dot_dimension_numbers<[1], [0], [0], [1], [0, 0, 1, 1], [], []>} : vector<8x32xf32>, vector<32x32xf32>, vector<8x32xf32> -> vector<8x32xf32>
    %cst_34 = arith.constant dense<0.000000e+00> : vector<8x32xf32>
    %85 = tpu.matmul %77, %6, %cst_34 {dimension_numbers = #tpu.dot_dimension_numbers<[1], [0], [0], [1], [0, 0, 1, 1], [], []>} : vector<8x32xf32>, vector<32x32xf32>, vector<8x32xf32> -> vector<8x32xf32>
    %cst_35 = arith.constant dense<0.000000e+00> : vector<8x32xf32>
    %86 = tpu.matmul %77, %8, %cst_35 {dimension_numbers = #tpu.dot_dimension_numbers<[1], [0], [0], [1], [0, 0, 1, 1], [], []>} : vector<8x32xf32>, vector<32x32xf32>, vector<8x32xf32> -> vector<8x32xf32>
    %87 = vector.extract_strided_slice %83 {offsets = [0, 0, 0], sizes = [1, 8, 32], strides = [1, 1, 1]} : vector<3x8x32xf32> to vector<1x8x32xf32>
    %88 = vector.shape_cast %87 : vector<1x8x32xf32> to vector<8x32xf32>
    %89 = arith.addf %88, %84 : vector<8x32xf32>
    %90 = arith.negf %89 : vector<8x32xf32>
    %91 = math.exp %90 : vector<8x32xf32>
    %cst_36 = arith.constant 1.000000e+00 : f32
    %92 = vector.broadcast %cst_36 : f32 to vector<8x32xf32>
    %93 = arith.addf %92, %91 : vector<8x32xf32>
    %94 = arith.divf %92, %93 : vector<8x32xf32>
    %95 = vector.extract_strided_slice %83 {offsets = [1, 0, 0], sizes = [1, 8, 32], strides = [1, 1, 1]} : vector<3x8x32xf32> to vector<1x8x32xf32>
    %96 = vector.shape_cast %95 : vector<1x8x32xf32> to vector<8x32xf32>
    %97 = arith.addf %96, %85 : vector<8x32xf32>
    %98 = arith.negf %97 : vector<8x32xf32>
    %99 = math.exp %98 : vector<8x32xf32>
    %cst_37 = arith.constant 1.000000e+00 : f32
    %100 = vector.broadcast %cst_37 : f32 to vector<8x32xf32>
    %101 = arith.addf %100, %99 : vector<8x32xf32>
    %102 = arith.divf %100, %101 : vector<8x32xf32>
    %103 = vector.extract_strided_slice %83 {offsets = [2, 0, 0], sizes = [1, 8, 32], strides = [1, 1, 1]} : vector<3x8x32xf32> to vector<1x8x32xf32>
    %104 = vector.shape_cast %103 : vector<1x8x32xf32> to vector<8x32xf32>
    %105 = arith.addf %86, %11 : vector<8x32xf32>
    %106 = arith.mulf %94, %105 : vector<8x32xf32>
    %107 = arith.addf %104, %106 : vector<8x32xf32>
    %108 = math.tanh %107 : vector<8x32xf32>
    %109 = arith.subf %77, %108 : vector<8x32xf32>
    %110 = arith.mulf %102, %109 : vector<8x32xf32>
    %111 = arith.addf %108, %110 : vector<8x32xf32>
    %c8_i32_38 = arith.constant 8 : i32
    %112 = arith.muli %c2_i32, %c8_i32_38 : i32
    %113 = arith.index_cast %112 : i32 to index
    %c0_39 = arith.constant 0 : index
    %114 = vector.load %arg11[%113, %c0_39] : memref<64x32xf32, #tpu.memory_space<vmem>>, vector<8x32xf32>
    tpu.vector_store %arg11[%113, %c0_39], %111 {strides = array<i32>} : memref<64x32xf32, #tpu.memory_space<vmem>>, vector<8x32xf32>,
    %c3_i32 = arith.constant 3 : i32
    %115 = arith.index_cast %c3_i32 : i32 to index
    %c0_40 = arith.constant 0 : index
    %c0_41 = arith.constant 0 : index
    %c0_42 = arith.constant 0 : index
    %116 = vector.load %arg2[%115, %c0_40, %c0_41, %c0_42] : memref<8x3x8x32xf32, #tpu.memory_space<vmem>>, vector<1x3x8x32xf32>
    %117 = vector.shape_cast %116 : vector<1x3x8x32xf32> to vector<3x8x32xf32>
    %cst_43 = arith.constant dense<0.000000e+00> : vector<8x32xf32>
    %118 = tpu.matmul %111, %4, %cst_43 {dimension_numbers = #tpu.dot_dimension_numbers<[1], [0], [0], [1], [0, 0, 1, 1], [], []>} : vector<8x32xf32>, vector<32x32xf32>, vector<8x32xf32> -> vector<8x32xf32>
    %cst_44 = arith.constant dense<0.000000e+00> : vector<8x32xf32>
    %119 = tpu.matmul %111, %6, %cst_44 {dimension_numbers = #tpu.dot_dimension_numbers<[1], [0], [0], [1], [0, 0, 1, 1], [], []>} : vector<8x32xf32>, vector<32x32xf32>, vector<8x32xf32> -> vector<8x32xf32>
    %cst_45 = arith.constant dense<0.000000e+00> : vector<8x32xf32>
    %120 = tpu.matmul %111, %8, %cst_45 {dimension_numbers = #tpu.dot_dimension_numbers<[1], [0], [0], [1], [0, 0, 1, 1], [], []>} : vector<8x32xf32>, vector<32x32xf32>, vector<8x32xf32> -> vector<8x32xf32>
    %121 = vector.extract_strided_slice %117 {offsets = [0, 0, 0], sizes = [1, 8, 32], strides = [1, 1, 1]} : vector<3x8x32xf32> to vector<1x8x32xf32>
    %122 = vector.shape_cast %121 : vector<1x8x32xf32> to vector<8x32xf32>
    %123 = arith.addf %122, %118 : vector<8x32xf32>
    %124 = arith.negf %123 : vector<8x32xf32>
    %125 = math.exp %124 : vector<8x32xf32>
    %cst_46 = arith.constant 1.000000e+00 : f32
    %126 = vector.broadcast %cst_46 : f32 to vector<8x32xf32>
    %127 = arith.addf %126, %125 : vector<8x32xf32>
    %128 = arith.divf %126, %127 : vector<8x32xf32>
    %129 = vector.extract_strided_slice %117 {offsets = [1, 0, 0], sizes = [1, 8, 32], strides = [1, 1, 1]} : vector<3x8x32xf32> to vector<1x8x32xf32>
    %130 = vector.shape_cast %129 : vector<1x8x32xf32> to vector<8x32xf32>
    %131 = arith.addf %130, %119 : vector<8x32xf32>
    %132 = arith.negf %131 : vector<8x32xf32>
    %133 = math.exp %132 : vector<8x32xf32>
    %cst_47 = arith.constant 1.000000e+00 : f32
    %134 = vector.broadcast %cst_47 : f32 to vector<8x32xf32>
    %135 = arith.addf %134, %133 : vector<8x32xf32>
    %136 = arith.divf %134, %135 : vector<8x32xf32>
    %137 = vector.extract_strided_slice %117 {offsets = [2, 0, 0], sizes = [1, 8, 32], strides = [1, 1, 1]} : vector<3x8x32xf32> to vector<1x8x32xf32>
    %138 = vector.shape_cast %137 : vector<1x8x32xf32> to vector<8x32xf32>
    %139 = arith.addf %120, %11 : vector<8x32xf32>
    %140 = arith.mulf %128, %139 : vector<8x32xf32>
    %141 = arith.addf %138, %140 : vector<8x32xf32>
    %142 = math.tanh %141 : vector<8x32xf32>
    %143 = arith.subf %111, %142 : vector<8x32xf32>
    %144 = arith.mulf %136, %143 : vector<8x32xf32>
    %145 = arith.addf %142, %144 : vector<8x32xf32>
    %c8_i32_48 = arith.constant 8 : i32
    %146 = arith.muli %c3_i32, %c8_i32_48 : i32
    %147 = arith.index_cast %146 : i32 to index
    %c0_49 = arith.constant 0 : index
    %148 = vector.load %arg11[%147, %c0_49] : memref<64x32xf32, #tpu.memory_space<vmem>>, vector<8x32xf32>
    tpu.vector_store %arg11[%147, %c0_49], %145 {strides = array<i32>} : memref<64x32xf32, #tpu.memory_space<vmem>>, vector<8x32xf32>,
    %c4_i32 = arith.constant 4 : i32
    %149 = arith.index_cast %c4_i32 : i32 to index
    %c0_50 = arith.constant 0 : index
    %c0_51 = arith.constant 0 : index
    %c0_52 = arith.constant 0 : index
    %150 = vector.load %arg2[%149, %c0_50, %c0_51, %c0_52] : memref<8x3x8x32xf32, #tpu.memory_space<vmem>>, vector<1x3x8x32xf32>
    %151 = vector.shape_cast %150 : vector<1x3x8x32xf32> to vector<3x8x32xf32>
    %cst_53 = arith.constant dense<0.000000e+00> : vector<8x32xf32>
    %152 = tpu.matmul %145, %4, %cst_53 {dimension_numbers = #tpu.dot_dimension_numbers<[1], [0], [0], [1], [0, 0, 1, 1], [], []>} : vector<8x32xf32>, vector<32x32xf32>, vector<8x32xf32> -> vector<8x32xf32>
    %cst_54 = arith.constant dense<0.000000e+00> : vector<8x32xf32>
    %153 = tpu.matmul %145, %6, %cst_54 {dimension_numbers = #tpu.dot_dimension_numbers<[1], [0], [0], [1], [0, 0, 1, 1], [], []>} : vector<8x32xf32>, vector<32x32xf32>, vector<8x32xf32> -> vector<8x32xf32>
    %cst_55 = arith.constant dense<0.000000e+00> : vector<8x32xf32>
    %154 = tpu.matmul %145, %8, %cst_55 {dimension_numbers = #tpu.dot_dimension_numbers<[1], [0], [0], [1], [0, 0, 1, 1], [], []>} : vector<8x32xf32>, vector<32x32xf32>, vector<8x32xf32> -> vector<8x32xf32>
    %155 = vector.extract_strided_slice %151 {offsets = [0, 0, 0], sizes = [1, 8, 32], strides = [1, 1, 1]} : vector<3x8x32xf32> to vector<1x8x32xf32>
    %156 = vector.shape_cast %155 : vector<1x8x32xf32> to vector<8x32xf32>
    %157 = arith.addf %156, %152 : vector<8x32xf32>
    %158 = arith.negf %157 : vector<8x32xf32>
    %159 = math.exp %158 : vector<8x32xf32>
    %cst_56 = arith.constant 1.000000e+00 : f32
    %160 = vector.broadcast %cst_56 : f32 to vector<8x32xf32>
    %161 = arith.addf %160, %159 : vector<8x32xf32>
    %162 = arith.divf %160, %161 : vector<8x32xf32>
    %163 = vector.extract_strided_slice %151 {offsets = [1, 0, 0], sizes = [1, 8, 32], strides = [1, 1, 1]} : vector<3x8x32xf32> to vector<1x8x32xf32>
    %164 = vector.shape_cast %163 : vector<1x8x32xf32> to vector<8x32xf32>
    %165 = arith.addf %164, %153 : vector<8x32xf32>
    %166 = arith.negf %165 : vector<8x32xf32>
    %167 = math.exp %166 : vector<8x32xf32>
    %cst_57 = arith.constant 1.000000e+00 : f32
    %168 = vector.broadcast %cst_57 : f32 to vector<8x32xf32>
    %169 = arith.addf %168, %167 : vector<8x32xf32>
    %170 = arith.divf %168, %169 : vector<8x32xf32>
    %171 = vector.extract_strided_slice %151 {offsets = [2, 0, 0], sizes = [1, 8, 32], strides = [1, 1, 1]} : vector<3x8x32xf32> to vector<1x8x32xf32>
    %172 = vector.shape_cast %171 : vector<1x8x32xf32> to vector<8x32xf32>
    %173 = arith.addf %154, %11 : vector<8x32xf32>
    %174 = arith.mulf %162, %173 : vector<8x32xf32>
    %175 = arith.addf %172, %174 : vector<8x32xf32>
    %176 = math.tanh %175 : vector<8x32xf32>
    %177 = arith.subf %145, %176 : vector<8x32xf32>
    %178 = arith.mulf %170, %177 : vector<8x32xf32>
    %179 = arith.addf %176, %178 : vector<8x32xf32>
    %c8_i32_58 = arith.constant 8 : i32
    %180 = arith.muli %c4_i32, %c8_i32_58 : i32
    %181 = arith.index_cast %180 : i32 to index
    %c0_59 = arith.constant 0 : index
    %182 = vector.load %arg11[%181, %c0_59] : memref<64x32xf32, #tpu.memory_space<vmem>>, vector<8x32xf32>
    tpu.vector_store %arg11[%181, %c0_59], %179 {strides = array<i32>} : memref<64x32xf32, #tpu.memory_space<vmem>>, vector<8x32xf32>,
    %c5_i32 = arith.constant 5 : i32
    %183 = arith.index_cast %c5_i32 : i32 to index
    %c0_60 = arith.constant 0 : index
    %c0_61 = arith.constant 0 : index
    %c0_62 = arith.constant 0 : index
    %184 = vector.load %arg2[%183, %c0_60, %c0_61, %c0_62] : memref<8x3x8x32xf32, #tpu.memory_space<vmem>>, vector<1x3x8x32xf32>
    %185 = vector.shape_cast %184 : vector<1x3x8x32xf32> to vector<3x8x32xf32>
    %cst_63 = arith.constant dense<0.000000e+00> : vector<8x32xf32>
    %186 = tpu.matmul %179, %4, %cst_63 {dimension_numbers = #tpu.dot_dimension_numbers<[1], [0], [0], [1], [0, 0, 1, 1], [], []>} : vector<8x32xf32>, vector<32x32xf32>, vector<8x32xf32> -> vector<8x32xf32>
    %cst_64 = arith.constant dense<0.000000e+00> : vector<8x32xf32>
    %187 = tpu.matmul %179, %6, %cst_64 {dimension_numbers = #tpu.dot_dimension_numbers<[1], [0], [0], [1], [0, 0, 1, 1], [], []>} : vector<8x32xf32>, vector<32x32xf32>, vector<8x32xf32> -> vector<8x32xf32>
    %cst_65 = arith.constant dense<0.000000e+00> : vector<8x32xf32>
    %188 = tpu.matmul %179, %8, %cst_65 {dimension_numbers = #tpu.dot_dimension_numbers<[1], [0], [0], [1], [0, 0, 1, 1], [], []>} : vector<8x32xf32>, vector<32x32xf32>, vector<8x32xf32> -> vector<8x32xf32>
    %189 = vector.extract_strided_slice %185 {offsets = [0, 0, 0], sizes = [1, 8, 32], strides = [1, 1, 1]} : vector<3x8x32xf32> to vector<1x8x32xf32>
    %190 = vector.shape_cast %189 : vector<1x8x32xf32> to vector<8x32xf32>
    %191 = arith.addf %190, %186 : vector<8x32xf32>
    %192 = arith.negf %191 : vector<8x32xf32>
    %193 = math.exp %192 : vector<8x32xf32>
    %cst_66 = arith.constant 1.000000e+00 : f32
    %194 = vector.broadcast %cst_66 : f32 to vector<8x32xf32>
    %195 = arith.addf %194, %193 : vector<8x32xf32>
    %196 = arith.divf %194, %195 : vector<8x32xf32>
    %197 = vector.extract_strided_slice %185 {offsets = [1, 0, 0], sizes = [1, 8, 32], strides = [1, 1, 1]} : vector<3x8x32xf32> to vector<1x8x32xf32>
    %198 = vector.shape_cast %197 : vector<1x8x32xf32> to vector<8x32xf32>
    %199 = arith.addf %198, %187 : vector<8x32xf32>
    %200 = arith.negf %199 : vector<8x32xf32>
    %201 = math.exp %200 : vector<8x32xf32>
    %cst_67 = arith.constant 1.000000e+00 : f32
    %202 = vector.broadcast %cst_67 : f32 to vector<8x32xf32>
    %203 = arith.addf %202, %201 : vector<8x32xf32>
    %204 = arith.divf %202, %203 : vector<8x32xf32>
    %205 = vector.extract_strided_slice %185 {offsets = [2, 0, 0], sizes = [1, 8, 32], strides = [1, 1, 1]} : vector<3x8x32xf32> to vector<1x8x32xf32>
    %206 = vector.shape_cast %205 : vector<1x8x32xf32> to vector<8x32xf32>
    %207 = arith.addf %188, %11 : vector<8x32xf32>
    %208 = arith.mulf %196, %207 : vector<8x32xf32>
    %209 = arith.addf %206, %208 : vector<8x32xf32>
    %210 = math.tanh %209 : vector<8x32xf32>
    %211 = arith.subf %179, %210 : vector<8x32xf32>
    %212 = arith.mulf %204, %211 : vector<8x32xf32>
    %213 = arith.addf %210, %212 : vector<8x32xf32>
    %c8_i32_68 = arith.constant 8 : i32
    %214 = arith.muli %c5_i32, %c8_i32_68 : i32
    %215 = arith.index_cast %214 : i32 to index
    %c0_69 = arith.constant 0 : index
    %216 = vector.load %arg11[%215, %c0_69] : memref<64x32xf32, #tpu.memory_space<vmem>>, vector<8x32xf32>
    tpu.vector_store %arg11[%215, %c0_69], %213 {strides = array<i32>} : memref<64x32xf32, #tpu.memory_space<vmem>>, vector<8x32xf32>,
    %c6_i32 = arith.constant 6 : i32
    %217 = arith.index_cast %c6_i32 : i32 to index
    %c0_70 = arith.constant 0 : index
    %c0_71 = arith.constant 0 : index
    %c0_72 = arith.constant 0 : index
    %218 = vector.load %arg2[%217, %c0_70, %c0_71, %c0_72] : memref<8x3x8x32xf32, #tpu.memory_space<vmem>>, vector<1x3x8x32xf32>
    %219 = vector.shape_cast %218 : vector<1x3x8x32xf32> to vector<3x8x32xf32>
    %cst_73 = arith.constant dense<0.000000e+00> : vector<8x32xf32>
    %220 = tpu.matmul %213, %4, %cst_73 {dimension_numbers = #tpu.dot_dimension_numbers<[1], [0], [0], [1], [0, 0, 1, 1], [], []>} : vector<8x32xf32>, vector<32x32xf32>, vector<8x32xf32> -> vector<8x32xf32>
    %cst_74 = arith.constant dense<0.000000e+00> : vector<8x32xf32>
    %221 = tpu.matmul %213, %6, %cst_74 {dimension_numbers = #tpu.dot_dimension_numbers<[1], [0], [0], [1], [0, 0, 1, 1], [], []>} : vector<8x32xf32>, vector<32x32xf32>, vector<8x32xf32> -> vector<8x32xf32>
    %cst_75 = arith.constant dense<0.000000e+00> : vector<8x32xf32>
    %222 = tpu.matmul %213, %8, %cst_75 {dimension_numbers = #tpu.dot_dimension_numbers<[1], [0], [0], [1], [0, 0, 1, 1], [], []>} : vector<8x32xf32>, vector<32x32xf32>, vector<8x32xf32> -> vector<8x32xf32>
    %223 = vector.extract_strided_slice %219 {offsets = [0, 0, 0], sizes = [1, 8, 32], strides = [1, 1, 1]} : vector<3x8x32xf32> to vector<1x8x32xf32>
    %224 = vector.shape_cast %223 : vector<1x8x32xf32> to vector<8x32xf32>
    %225 = arith.addf %224, %220 : vector<8x32xf32>
    %226 = arith.negf %225 : vector<8x32xf32>
    %227 = math.exp %226 : vector<8x32xf32>
    %cst_76 = arith.constant 1.000000e+00 : f32
    %228 = vector.broadcast %cst_76 : f32 to vector<8x32xf32>
    %229 = arith.addf %228, %227 : vector<8x32xf32>
    %230 = arith.divf %228, %229 : vector<8x32xf32>
    %231 = vector.extract_strided_slice %219 {offsets = [1, 0, 0], sizes = [1, 8, 32], strides = [1, 1, 1]} : vector<3x8x32xf32> to vector<1x8x32xf32>
    %232 = vector.shape_cast %231 : vector<1x8x32xf32> to vector<8x32xf32>
    %233 = arith.addf %232, %221 : vector<8x32xf32>
    %234 = arith.negf %233 : vector<8x32xf32>
    %235 = math.exp %234 : vector<8x32xf32>
    %cst_77 = arith.constant 1.000000e+00 : f32
    %236 = vector.broadcast %cst_77 : f32 to vector<8x32xf32>
    %237 = arith.addf %236, %235 : vector<8x32xf32>
    %238 = arith.divf %236, %237 : vector<8x32xf32>
    %239 = vector.extract_strided_slice %219 {offsets = [2, 0, 0], sizes = [1, 8, 32], strides = [1, 1, 1]} : vector<3x8x32xf32> to vector<1x8x32xf32>
    %240 = vector.shape_cast %239 : vector<1x8x32xf32> to vector<8x32xf32>
    %241 = arith.addf %222, %11 : vector<8x32xf32>
    %242 = arith.mulf %230, %241 : vector<8x32xf32>
    %243 = arith.addf %240, %242 : vector<8x32xf32>
    %244 = math.tanh %243 : vector<8x32xf32>
    %245 = arith.subf %213, %244 : vector<8x32xf32>
    %246 = arith.mulf %238, %245 : vector<8x32xf32>
    %247 = arith.addf %244, %246 : vector<8x32xf32>
    %c8_i32_78 = arith.constant 8 : i32
    %248 = arith.muli %c6_i32, %c8_i32_78 : i32
    %249 = arith.index_cast %248 : i32 to index
    %c0_79 = arith.constant 0 : index
    %250 = vector.load %arg11[%249, %c0_79] : memref<64x32xf32, #tpu.memory_space<vmem>>, vector<8x32xf32>
    tpu.vector_store %arg11[%249, %c0_79], %247 {strides = array<i32>} : memref<64x32xf32, #tpu.memory_space<vmem>>, vector<8x32xf32>,
    %c7_i32 = arith.constant 7 : i32
    %251 = arith.index_cast %c7_i32 : i32 to index
    %c0_80 = arith.constant 0 : index
    %c0_81 = arith.constant 0 : index
    %c0_82 = arith.constant 0 : index
    %252 = vector.load %arg2[%251, %c0_80, %c0_81, %c0_82] : memref<8x3x8x32xf32, #tpu.memory_space<vmem>>, vector<1x3x8x32xf32>
    %253 = vector.shape_cast %252 : vector<1x3x8x32xf32> to vector<3x8x32xf32>
    %cst_83 = arith.constant dense<0.000000e+00> : vector<8x32xf32>
    %254 = tpu.matmul %247, %4, %cst_83 {dimension_numbers = #tpu.dot_dimension_numbers<[1], [0], [0], [1], [0, 0, 1, 1], [], []>} : vector<8x32xf32>, vector<32x32xf32>, vector<8x32xf32> -> vector<8x32xf32>
    %cst_84 = arith.constant dense<0.000000e+00> : vector<8x32xf32>
    %255 = tpu.matmul %247, %6, %cst_84 {dimension_numbers = #tpu.dot_dimension_numbers<[1], [0], [0], [1], [0, 0, 1, 1], [], []>} : vector<8x32xf32>, vector<32x32xf32>, vector<8x32xf32> -> vector<8x32xf32>
    %cst_85 = arith.constant dense<0.000000e+00> : vector<8x32xf32>
    %256 = tpu.matmul %247, %8, %cst_85 {dimension_numbers = #tpu.dot_dimension_numbers<[1], [0], [0], [1], [0, 0, 1, 1], [], []>} : vector<8x32xf32>, vector<32x32xf32>, vector<8x32xf32> -> vector<8x32xf32>
    %257 = vector.extract_strided_slice %253 {offsets = [0, 0, 0], sizes = [1, 8, 32], strides = [1, 1, 1]} : vector<3x8x32xf32> to vector<1x8x32xf32>
    %258 = vector.shape_cast %257 : vector<1x8x32xf32> to vector<8x32xf32>
    %259 = arith.addf %258, %254 : vector<8x32xf32>
    %260 = arith.negf %259 : vector<8x32xf32>
    %261 = math.exp %260 : vector<8x32xf32>
    %cst_86 = arith.constant 1.000000e+00 : f32
    %262 = vector.broadcast %cst_86 : f32 to vector<8x32xf32>
    %263 = arith.addf %262, %261 : vector<8x32xf32>
    %264 = arith.divf %262, %263 : vector<8x32xf32>
    %265 = vector.extract_strided_slice %253 {offsets = [1, 0, 0], sizes = [1, 8, 32], strides = [1, 1, 1]} : vector<3x8x32xf32> to vector<1x8x32xf32>
    %266 = vector.shape_cast %265 : vector<1x8x32xf32> to vector<8x32xf32>
    %267 = arith.addf %266, %255 : vector<8x32xf32>
    %268 = arith.negf %267 : vector<8x32xf32>
    %269 = math.exp %268 : vector<8x32xf32>
    %cst_87 = arith.constant 1.000000e+00 : f32
    %270 = vector.broadcast %cst_87 : f32 to vector<8x32xf32>
    %271 = arith.addf %270, %269 : vector<8x32xf32>
    %272 = arith.divf %270, %271 : vector<8x32xf32>
    %273 = vector.extract_strided_slice %253 {offsets = [2, 0, 0], sizes = [1, 8, 32], strides = [1, 1, 1]} : vector<3x8x32xf32> to vector<1x8x32xf32>
    %274 = vector.shape_cast %273 : vector<1x8x32xf32> to vector<8x32xf32>
    %275 = arith.addf %256, %11 : vector<8x32xf32>
    %276 = arith.mulf %264, %275 : vector<8x32xf32>
    %277 = arith.addf %274, %276 : vector<8x32xf32>
    %278 = math.tanh %277 : vector<8x32xf32>
    %279 = arith.subf %247, %278 : vector<8x32xf32>
    %280 = arith.mulf %272, %279 : vector<8x32xf32>
    %281 = arith.addf %278, %280 : vector<8x32xf32>
    %c8_i32_88 = arith.constant 8 : i32
    %282 = arith.muli %c7_i32, %c8_i32_88 : i32
    %283 = arith.index_cast %282 : i32 to index
    %c0_89 = arith.constant 0 : index
    %284 = vector.load %arg11[%283, %c0_89] : memref<64x32xf32, #tpu.memory_space<vmem>>, vector<8x32xf32>
    tpu.vector_store %arg11[%283, %c0_89], %281 {strides = array<i32>} : memref<64x32xf32, #tpu.memory_space<vmem>>, vector<8x32xf32>,
    %c8_i32_90 = arith.constant 8 : i32
    %c0_91 = arith.constant 0 : index
    %c0_92 = arith.constant 0 : index
    %285 = vector.load %arg10[%c0_91, %c0_92] : memref<8x32xf32, #tpu.memory_space<vmem>>, vector<8x32xf32>
    tpu.vector_store %arg10[%c0_91, %c0_92], %281 {strides = array<i32>} : memref<8x32xf32, #tpu.memory_space<vmem>>, vector<8x32xf32>,
    %c0_93 = arith.constant 0 : index
    %c0_94 = arith.constant 0 : index
    %286 = vector.load %arg11[%c0_93, %c0_94] : memref<64x32xf32, #tpu.memory_space<vmem>>, vector<64x32xf32>
    %c0_95 = arith.constant 0 : index
    %c0_96 = arith.constant 0 : index
    %287 = vector.load %arg5[%c0_95, %c0_96] : memref<32x32xf32, #tpu.memory_space<vmem>>, vector<32x32xf32>
    %cst_97 = arith.constant dense<0.000000e+00> : vector<64x32xf32>
    %288 = tpu.matmul %286, %287, %cst_97 {dimension_numbers = #tpu.dot_dimension_numbers<[1], [0], [0], [1], [0, 0, 1, 1], [], []>} : vector<64x32xf32>, vector<32x32xf32>, vector<64x32xf32> -> vector<64x32xf32>
    %c0_98 = arith.constant 0 : index
    %c0_99 = arith.constant 0 : index
    %289 = vector.load %arg6[%c0_98, %c0_99] : memref<1x32xf32, #tpu.memory_space<vmem>>, vector<1x32xf32>
    %290 = vector.broadcast %289 : vector<1x32xf32> to vector<64x32xf32>
    %291 = arith.addf %288, %290 : vector<64x32xf32>
    %cst_100 = arith.constant 0.000000e+00 : f32
    %292 = vector.broadcast %cst_100 : f32 to vector<64x32xf32>
    %293 = arith.maximumf %291, %292 : vector<64x32xf32>
    %c0_101 = arith.constant 0 : index
    %c0_102 = arith.constant 0 : index
    %294 = vector.load %arg7[%c0_101, %c0_102] : memref<32x128xf32, #tpu.memory_space<vmem>>, vector<32x128xf32>
    %cst_103 = arith.constant dense<0.000000e+00> : vector<64x128xf32>
    %295 = tpu.matmul %293, %294, %cst_103 {dimension_numbers = #tpu.dot_dimension_numbers<[1], [0], [0], [1], [0, 0, 1, 1], [], []>} : vector<64x32xf32>, vector<32x128xf32>, vector<64x128xf32> -> vector<64x128xf32>
    %c0_104 = arith.constant 0 : index
    %c0_105 = arith.constant 0 : index
    %296 = vector.load %arg8[%c0_104, %c0_105] : memref<1x128xf32, #tpu.memory_space<vmem>>, vector<1x128xf32>
    %297 = vector.broadcast %296 : vector<1x128xf32> to vector<64x128xf32>
    %298 = arith.addf %295, %297 : vector<64x128xf32>
    %299 = vector.shape_cast %298 : vector<64x128xf32> to vector<8x8x128xf32>
    %c0_106 = arith.constant 0 : index
    %c0_107 = arith.constant 0 : index
    %c0_108 = arith.constant 0 : index
    %300 = vector.load %arg9[%c0_106, %c0_107, %c0_108] : memref<8x8x128xf32, #tpu.memory_space<vmem>>, vector<8x8x128xf32>
    tpu.vector_store %arg9[%c0_106, %c0_107, %c0_108], %299 {strides = array<i32>} : memref<8x8x128xf32, #tpu.memory_space<vmem>>, vector<8x8x128xf32>,
    return
  }
  func.func @transform_0(%arg0: i32, %arg1: i32) -> (i32, i32, i32, i32) {
    %c0_i32 = arith.constant 0 : i32
    %c0_i32_0 = arith.constant 0 : i32
    %c0_i32_1 = arith.constant 0 : i32
    return %arg1, %c0_i32, %arg0, %c0_i32_0 : i32, i32, i32, i32
  }
  func.func @transform_1(%arg0: i32, %arg1: i32) -> (i32, i32, i32) {
    %c0_i32 = arith.constant 0 : i32
    %c0_i32_0 = arith.constant 0 : i32
    %c0_i32_1 = arith.constant 0 : i32
    %c0_i32_2 = arith.constant 0 : i32
    return %c0_i32, %c0_i32_0, %c0_i32_1 : i32, i32, i32
  }
  func.func @transform_2(%arg0: i32, %arg1: i32) -> (i32, i32) {
    %c0_i32 = arith.constant 0 : i32
    %c0_i32_0 = arith.constant 0 : i32
    %c0_i32_1 = arith.constant 0 : i32
    return %c0_i32, %c0_i32_0 : i32, i32
  }
  func.func @transform_3(%arg0: i32, %arg1: i32) -> (i32, i32) {
    %c0_i32 = arith.constant 0 : i32
    %c0_i32_0 = arith.constant 0 : i32
    %c0_i32_1 = arith.constant 0 : i32
    return %c0_i32, %c0_i32_0 : i32, i32
  }
  func.func @transform_4(%arg0: i32, %arg1: i32) -> (i32, i32) {
    %c0_i32 = arith.constant 0 : i32
    %c0_i32_0 = arith.constant 0 : i32
    %c0_i32_1 = arith.constant 0 : i32
    return %c0_i32, %c0_i32_0 : i32, i32
  }
  func.func @transform_5(%arg0: i32, %arg1: i32) -> (i32, i32) {
    %c0_i32 = arith.constant 0 : i32
    %c0_i32_0 = arith.constant 0 : i32
    %c0_i32_1 = arith.constant 0 : i32
    return %c0_i32, %c0_i32_0 : i32, i32
  }
  func.func @transform_6(%arg0: i32, %arg1: i32) -> (i32, i32) {
    %c0_i32 = arith.constant 0 : i32
    %c0_i32_0 = arith.constant 0 : i32
    %c0_i32_1 = arith.constant 0 : i32
    return %c0_i32, %c0_i32_0 : i32, i32
  }
  func.func @transform_7(%arg0: i32, %arg1: i32) -> (i32, i32, i32) {
    %c0_i32 = arith.constant 0 : i32
    %c0_i32_0 = arith.constant 0 : i32
    return %arg1, %arg0, %c0_i32 : i32, i32, i32
  }
}

</mosaic_0001>

<bundles_post_ra>
// kernel: tpu_custom_call.1
= control target key start
LH: loop header
LB: loop body
LE: loop exit
PB: predicated region body
PF: predicated region fallthrough
CT: control target
= control target key end

     0   :  { %12 = vsyncpa [#allocation5], 0  ;;  %s3595_s0 = inlined_call_operand.hbm [shape: f32[8,3,8,32], index: 0, kind: input, shape index: {}]   ;;  %s3596_s1 = inlined_call_operand.hbm [shape: f32[3,32,32], index: 1, kind: input, shape index: {}]   ;;  %s3597_s2 = inlined_call_operand.vmem [shape: f32[1,32], index: 2, kind: input, shape index: {}]   ;;  %s3598_s3 = inlined_call_operand.hbm [shape: f32[32,32], index: 3, kind: input, shape index: {}]   ;;  %s3599_s4 = inlined_call_operand.vmem [shape: f32[1,32], index: 4, kind: input, shape index: {}]   ;;  %s3600_s5 = inlined_call_operand.hbm [shape: f32[32,128], index: 5, kind: input, shape index: {}]   ;;  %s3601_s6 = inlined_call_operand.vmem [shape: f32[1,128], index: 6, kind: input, shape index: {}]   ;;  %s3602_s7 = inlined_call_operand.hbm [shape: f32[8,8,128], index: 7, kind: output, shape index: {}]  }
   0x1   :  { %13 = vsyncpa [#allocation8], 0 }
   0x2   :  { %14 = vsyncpa [#allocation11], 0 }
   0x3   :  { %15 = vsyncpa [#allocation6], 0  ;;  %s3213_s24 = smov [#allocation7]   ;;  %s3214_s26 = smov [#allocation4]  }
   0x4   :  { %s33_s25 = sshll.u32 %s3213_s24, 4  ;;  %s21_s27 = sshll.u32 %s3214_s26, 4  ;;  %s34_s25 = int_to_ptr.vmem [resolvable:$true] %s33_s25  ;;  %s3263_s27 = int_to_ptr.vmem [resolvable:$true] %s21_s27 }
   0x5   :  { %s3095_s30 = scalar_lea.hbm %s3596_s1, 1536 }
   0x6   :  { %p3096_p0 = scmp.ne.s32.totalorder %s3596_s1, %s3095_s30  ;;  %p3099_p1 = scmp.lt.u32.totalorder %s3095_s30, %s3596_s1 }
   0x8   :  { %p3101_p2 = pnand %p3099_p1, %p3096_p0 }
   0xa   :  { %3104 = shalt.err (!%p3101_p2)
}
   0xb   :  { %s3105_s12 = scalar_lea.vmem %s34_s25, 1536  ;;  %p3110_p4 = scmp.lt.s32.totalorder %s34_s25, %s34_s25 }
   0xc   :  { %p3106_p3 = scmp.ne.s32.totalorder %s34_s25, %s3105_s12  ;;  %p3111_p5 = scmp.lt.s32.totalorder %s3105_s12, %s3105_s12 }
   0xe   :  { %p3112_p6 = por %p3111_p5, %p3110_p4 }
  0x10   :  { %p3113_p7 = pnand %p3112_p6, %p3106_p3 }
  0x12   :  { %3116 = shalt.err (!%p3113_p7)
}
  0x13   :  { %s3215_s13 = smov 128   ;;  %s3216_s14 = smov 8  }
  0x14   :  { %39 = dma.hbm_to_vmem [thread:$0]  %s3596_s1, 1536, %s34_s25, [#allocation8], %s3215_s13, %s3215_s13, %s3216_s14  }
  0x15   :  { %s3117_s19 = scalar_lea.hbm %s3595_s0, 3072 }
  0x16   :  { %p3118_p8 = scmp.ne.s32.totalorder %s3595_s0, %s3117_s19  ;;  %p3121_p9 = scmp.lt.u32.totalorder %s3117_s19, %s3595_s0 }
  0x18   :  { %p3123_p10 = pnand %p3121_p9, %p3118_p8 }
  0x1a   :  { %3126 = shalt.err (!%p3123_p10)
}
  0x1b   :  { %s3127_s24 = scalar_lea.vmem %s3263_s27, 3072  ;;  %p3132_p12 = scmp.lt.s32.totalorder %s3263_s27, %s3263_s27 }
  0x1c   :  { %p3128_p11 = scmp.ne.s32.totalorder %s3263_s27, %s3127_s24  ;;  %p3133_p13 = scmp.lt.s32.totalorder %s3127_s24, %s3127_s24 }
  0x1e   :  { %p3134_p0 = por %p3133_p13, %p3132_p12 }
  0x20   :  { %p3135_p1 = pnand %p3134_p0, %p3128_p11 }
  0x22   :  { %3138 = shalt.err (!%p3135_p1)
}
  0x23   :  { %27 = dma.hbm_to_vmem [thread:$0]  %s3595_s0, 3072, %s3263_s27, [#allocation5], %s3215_s13, %s3215_s13, %s3216_s14  }
  0x24   :  { %s3217_s26 = smov [#allocation9]   ;;  %s3218_s29 = smov [#allocation10]  }
  0x25   :  { %s47_s28 = sshll.u32 %s3217_s26, 4  ;;  %s61_s30 = sshll.u32 %s3218_s29, 4  ;;  %s48_s28 = int_to_ptr.vmem [resolvable:$true] %s47_s28  ;;  %s3300_s30 = int_to_ptr.vmem [resolvable:$true] %s61_s30 }
  0x26   :  { %s3139_s10 = scalar_lea.hbm %s3598_s3, 512 }
  0x27   :  { %p3140_p2 = scmp.ne.s32.totalorder %s3598_s3, %s3139_s10  ;;  %p3143_p3 = scmp.lt.u32.totalorder %s3139_s10, %s3598_s3 }
  0x29   :  { %p3145_p4 = pnand %p3143_p3, %p3140_p2 }
  0x2b   :  { %3148 = shalt.err (!%p3145_p4)
}
  0x2c   :  { %s3149_s0 = scalar_lea.vmem %s48_s28, 512  ;;  %p3154_p6 = scmp.lt.s32.totalorder %s48_s28, %s48_s28 }
  0x2d   :  { %p3150_p5 = scmp.ne.s32.totalorder %s48_s28, %s3149_s0  ;;  %p3155_p7 = scmp.lt.s32.totalorder %s3149_s0, %s3149_s0 }
  0x2f   :  { %p3156_p8 = por %p3155_p7, %p3154_p6 }
  0x31   :  { %p3157_p9 = pnand %p3156_p8, %p3150_p5 }
  0x33   :  { %3160 = shalt.err (!%p3157_p9)
}
  0x34   :  { %53 = dma.hbm_to_vmem [thread:$0]  %s3598_s3, 512, %s48_s28, [#allocation8], %s3215_s13, %s3215_s13, %s3216_s14  }
  0x35   :  { %s3161_s20 = scalar_lea.hbm %s3600_s5, 512 }
  0x36   :  { %p3162_p10 = scmp.ne.s32.totalorder %s3600_s5, %s3161_s20  ;;  %p3165_p11 = scmp.lt.u32.totalorder %s3161_s20, %s3600_s5 }
  0x38   :  { %p3167_p12 = pnand %p3165_p11, %p3162_p10 }
  0x3a   :  { %3170 = shalt.err (!%p3167_p12)
}
  0x3b   :  { %s3171_s1 = scalar_lea.vmem %s3300_s30, 512  ;;  %p3176_p0 = scmp.lt.s32.totalorder %s3300_s30, %s3300_s30 }
  0x3c   :  { %p3172_p13 = scmp.ne.s32.totalorder %s3300_s30, %s3171_s1  ;;  %p3177_p1 = scmp.lt.s32.totalorder %s3171_s1, %s3171_s1 }
  0x3e   :  { %p3178_p2 = por %p3177_p1, %p3176_p0 }
  0x40   :  { %p3179_p3 = pnand %p3178_p2, %p3172_p13 }
  0x42   :  { %3182 = shalt.err (!%p3179_p3)
}
  0x43   :  { %67 = dma.hbm_to_vmem [thread:$0]  %s3600_s5, 512, %s3300_s30, [#allocation11], %s3215_s13, %s3215_s13, %s3216_s14  }
  0x44   :  { %3205 = dma.done.wait [#allocation5], 3072  }
  0x45   :  { %3206 = vsyncadd [#allocation5], 4294964224 }
  0x46   :  { %3207 = dma.done.wait [#allocation8], 2048  }
  0x47   :  { %3208 = vsyncadd [#allocation8], 4294965248 }
  0x48   :  { %3209 = dma.done.wait [#allocation11], 512  }
  0x49   :  { %3210 = vsyncadd [#allocation11], 4294966784  ;;  %vm86_vm0 = vcmask 261120   ;;  %v3219_v0 = vmov 0.0|0.0   ;;  %vm3220_vm1 = vmmov 0   ;;  %v3221_v1 = vmov 0.0  }
  0x4a   :  { %2845 = vmatprep.subr.bf16.mxu0 %v3219_v0  ;;  %2549 = vmatprep.mubr.msk.f32.mxu0 %vm3220_vm1, %v3221_v1  ;;  %87 = vst.msk [vmem:[#allocation2] sm:$0xff] %vm86_vm0, %v3221_v1  ;;  %v88_v2 = vld [vmem:[#allocation7] sm:$0xff]  ;;  %v89_v3 = vld [vmem:[#allocation7 + $0x8] sm:$0xff]  ;;  %v90_v4 = vld [vmem:[#allocation7 + $0x10] sm:$0xff] }
  0x4b   :  { %2851 = vmatprep.subr.bf16.mxu1 %v3219_v0  ;;  %2560 = vmatprep.mubr.msk.f32.mxu1 %vm3220_vm1, %v3221_v1  ;;  %v3345_v5 = vpack.c.bf16 %v89_v3, %v88_v2  ;;  %v91_v6 = vld [vmem:[#allocation7 + $0x18] sm:$0xff]  ;;  %v93_v7 = vld [vmem:[#allocation7 + $0x20] sm:$0xff]  ;;  %v94_v8 = vld [vmem:[#allocation7 + $0x28] sm:$0xff] }
  0x4c   :  { %v95_v9 = vld [vmem:[#allocation7 + $0x30] sm:$0xff]  ;;  %v96_v10 = vld [vmem:[#allocation7 + $0x38] sm:$0xff]  ;;  %v3348_v11 = vpack.c.bf16 %v91_v6, %v90_v4  ;;  %v3350_v12 = vpack.c.bf16 %v94_v8, %v93_v7  ;;  %v98_v13 = vld [vmem:[#allocation7 + $0x40] sm:$0xff] }
  0x4d   :  { %2847 = vmatpush3.bf16.msra.mxu0 %v3345_v5  ;;  %v99_v14 = vld [vmem:[#allocation7 + $0x48] sm:$0xff]  ;;  %v3354_v15 = vpack.c.bf16 %v96_v10, %v95_v9  ;;  %v100_v18 = vld [vmem:[#allocation7 + $0x50] sm:$0xff]  ;;  %v101_v19 = vld [vmem:[#allocation7 + $0x58] sm:$0xff] }
  0x4e   :  { %2848 = vmatprep.subr.bf16.mxu0 %v3219_v0  ;;  %2853 = vmatpush3.bf16.msra.mxu1 %v3350_v12  ;;  %v3358_v17 = vpack.c.bf16 %v99_v14, %v98_v13  ;;  %v3365_v20 = vpack.c.bf16 %v101_v19, %v100_v18  ;;  %v110_v21 = vld [vmem:[#allocation4] sm:$0xff]  ;;  %v111_v28 = vld [vmem:[#allocation4 + $0x8] sm:$0xff]  ;;  %v3389_v35 = vld [vmem:[%s3597_s2] ss:$0 sm:$0xff] }
  0x4f   :  { %2854 = vmatprep.subr.bf16.mxu1 %v3219_v0  ;;  %v112_v40 = vld [vmem:[#allocation4 + $0x10] sm:$0xff]  ;;  %v349_v48 = vld [vmem:[#allocation4 + $0x18] sm:$0xff]  ;;  %v350_v55 = vld [vmem:[#allocation4 + $0x20] sm:$0xff] }
  0x50   :  { %v351_v3 = vld [vmem:[#allocation4 + $0x28] sm:$0xff] }
  0x51   :  { %2850 = vmatpush3.bf16.msra.mxu0 %v3348_v11  ;;  %v109_v16 = vld [vmem:[#allocation2] sm:$0xff] }
  0x52   :  { %2857 = vmatprep.subr.bf16.mxu0 %v3219_v0  ;;  %2856 = vmatpush3.bf16.msra.mxu1 %v3354_v15 }
  0x53   :  { %2863 = vmatprep.subr.bf16.mxu1 %v3219_v0 }
  0x54   :  { %2550 = vmatmul.mubr.msk.f32.vlgmr.msra.gmra.mrb[0].mxu0 %vm86_vm0, %v109_v16 }
  0x55   :  { %2859 = vmatpush3.bf16.msra.mxu0 %v3358_v17  ;;  %2571 = vmatprep.mubr.msk.f32.mxu0 %vm3220_vm1, %v3221_v1 }
  0x56   :  { %2561 = vmatmul.mubr.msk.f32.vlgmr.msra.gmra.mrb[0].mxu1 %vm86_vm0, %v109_v16  ;;  %2860 = vmatprep.subr.bf16.mxu0 %v3219_v0 }
  0x57   :  { %2865 = vmatpush3.bf16.msra.mxu1 %v3345_v5  ;;  %2582 = vmatprep.mubr.msk.f32.mxu1 %vm3220_vm1, %v3221_v1 }
  0x58   :  { %2866 = vmatprep.subr.bf16.mxu1 %v3219_v0 }
  0x59   :  { %2862 = vmatpush3.bf16.msra.mxu0 %v3365_v20 }
  0x5a   :  { %2869 = vmatprep.subr.bf16.mxu0 %v3219_v0 }
  0x5b   :  { %2868 = vmatpush3.bf16.msra.mxu1 %v3348_v11 }
  0x5c   :  { %2572 = vmatmul.mubr.msk.f32.vlgmr.msra.gmra.mrb[2].mxu0 %vm86_vm0, %v109_v16  ;;  %2875 = vmatprep.subr.bf16.mxu1 %v3219_v0 }
  0x5d   :  { %2871 = vmatpush3.bf16.msra.mxu0 %v3350_v12  ;;  %2593 = vmatprep.mubr.msk.f32.mxu0 %vm3220_vm1, %v3221_v1 }
  0x5e   :  { %2872 = vmatprep.subr.bf16.mxu0 %v3219_v0 }
  0x61   :  { %2874 = vmatpush3.bf16.msra.mxu0 %v3354_v15 }
  0x62   :  { %2881 = vmatprep.subr.bf16.mxu0 %v3219_v0 }
 0x127   :  { %v183_v22 = vpop.f32.mrb[0].mxu0 }
 0x128   :  { %v257_v23 = vadd.f32 %v183_v22, %v110_v21  ;;  %v2551_v24 = vpop.f32.mrb[1].mxu0 }
 0x129   :  { %v253_v25 = vpop.f32.mrb[0].mxu1 }
 0x12a   :  { %v2341_v26 = vmul.f32 -1.442695, %v257_v23  ;;  %v2562_v27 = vpop.f32.mrb[1].mxu1  ;;  %v264_v29 = vadd.f32 %v253_v25, %v111_v28  ;;  %v588_v25 = vld [vmem:[#allocation4 + $0x38] sm:$0xff] }
 0x12c   :  { %3015 = vpow2.f32 %v2341_v26  ;;  %v2342_v32 = vmul.f32 -1.442695, %v264_v29 }
 0x12e   :  { %3017 = vpow2.f32 %v2342_v32 }
 0x12f   :  { %v337_v30 = vpop.f32.mrb[2].mxu0 }
 0x130   :  { %v2573_v31 = vpop.f32.mrb[3].mxu0  ;;  %v338_v37 = vadd.f32 %v3389_v35, %v337_v30 }
 0x136   :  { %v3016_v33 = vpop.eup %3015 }
 0x137   :  { %v261_v34 = vadd.f32 1.0, %v3016_v33 }
 0x138   :  { %v3018_v36 = vpop.eup %3017 }
 0x139   :  { %3019 = vrcp.f32 %v261_v34  ;;  %v268_v39 = vadd.f32 1.0, %v3018_v36  ;;  %v589_v36 = vld [vmem:[#allocation4 + $0x40] sm:$0xff] }
 0x13b   :  { %3021 = vrcp.f32 %v268_v39 }
 0x143   :  { %v3020_v38 = vpop.eup %3019 }
 0x144   :  { %v341_v41 = vmul.f32 %v3020_v38, %v338_v37 }
 0x145   :  { %v3022_v43 = vpop.eup %3021 }
 0x146   :  { %v342_v42 = vadd.f32 %v341_v41, %v112_v40 }
 0x148   :  { %3023 = vtanh.f32 %v342_v42 }
 0x152   :  { %v3024_v44 = vpop.eup %3023 }
 0x153   :  { %v344_v45 = vsub.f32 %v109_v16, %v3024_v44  ;;  %v587_v16 = vld [vmem:[#allocation4 + $0x30] sm:$0xff] }
 0x155   :  { %v345_v46 = vmul.f32 %v3022_v43, %v344_v45  ;;  %v825_v45 = vld [vmem:[#allocation4 + $0x48] sm:$0xff] }
 0x157   :  { %v346_v47 = vadd.f32 %v3024_v44, %v345_v46 }
 0x159   :  { %347 = vst.msk [vmem:[#allocation3] sm:$0xff] %vm86_vm0, %v346_v47  ;;  %2583 = vmatmul.mubr.msk.f32.vlgmr.msra.gmra.mrb[2].mxu1 %vm86_vm0, %v346_v47  ;;  %2594 = vmatmul.mubr.msk.f32.vlgmr.msra.gmra.mrb[4].mxu0 %vm86_vm0, %v346_v47 }
 0x15a   :  { %2877 = vmatpush3.bf16.msra.mxu1 %v3358_v17  ;;  %2604 = vmatprep.mubr.msk.f32.mxu1 %vm3220_vm1, %v3221_v1 }
 0x15b   :  { %2878 = vmatprep.subr.bf16.mxu1 %v3219_v0  ;;  %2883 = vmatpush3.bf16.msra.mxu0 %v3345_v5 }
 0x15c   :  { %2884 = vmatprep.subr.bf16.mxu0 %v3219_v0  ;;  %2615 = vmatprep.mubr.msk.f32.mxu0 %vm3220_vm1, %v3221_v1 }
 0x15e   :  { %2880 = vmatpush3.bf16.msra.mxu1 %v3365_v20 }
 0x15f   :  { %2887 = vmatprep.subr.bf16.mxu1 %v3219_v0  ;;  %2886 = vmatpush3.bf16.msra.mxu0 %v3348_v11 }
 0x160   :  { %2893 = vmatprep.subr.bf16.mxu0 %v3219_v0 }
 0x161   :  { %2605 = vmatmul.mubr.msk.f32.vlgmr.msra.gmra.mrb[4].mxu1 %vm86_vm0, %v346_v47 }
 0x162   :  { %2889 = vmatpush3.bf16.msra.mxu1 %v3350_v12  ;;  %2626 = vmatprep.mubr.msk.f32.mxu1 %vm3220_vm1, %v3221_v1 }
 0x163   :  { %2890 = vmatprep.subr.bf16.mxu1 %v3219_v0 }
 0x166   :  { %2892 = vmatpush3.bf16.msra.mxu1 %v3354_v15 }
 0x167   :  { %2899 = vmatprep.subr.bf16.mxu1 %v3219_v0 }
 0x22c   :  { %v421_v49 = vpop.f32.mrb[2].mxu1  ;;  %v491_v50 = vpop.f32.mrb[4].mxu0 }
 0x22d   :  { %v495_v51 = vadd.f32 %v421_v49, %v349_v48  ;;  %v2584_v52 = vpop.f32.mrb[3].mxu1  ;;  %v2595_v53 = vpop.f32.mrb[5].mxu0  ;;  %v502_v57 = vadd.f32 %v491_v50, %v350_v55 }
 0x22e   :  { %v826_v52 = vld [vmem:[#allocation4 + $0x50] sm:$0xff] }
 0x22f   :  { %v2346_v54 = vmul.f32 -1.442695, %v495_v51  ;;  %v2347_v59 = vmul.f32 -1.442695, %v502_v57 }
 0x231   :  { %3025 = vpow2.f32 %v2346_v54 }
 0x232   :  { %3027 = vpow2.f32 %v2347_v59 }
 0x234   :  { %v575_v56 = vpop.f32.mrb[4].mxu1 }
 0x235   :  { %v2606_v58 = vpop.f32.mrb[5].mxu1  ;;  %v576_v63 = vadd.f32 %v3389_v35, %v575_v56 }
 0x23b   :  { %v3026_v60 = vpop.eup %3025 }
 0x23c   :  { %v499_v61 = vadd.f32 1.0, %v3026_v60  ;;  %v3028_v62 = vpop.eup %3027 }
 0x23d   :  { %v506_v6 = vadd.f32 1.0, %v3028_v62  ;;  %v827_v62 = vld [vmem:[#allocation4 + $0x58] sm:$0xff] }
 0x23e   :  { %3029 = vrcp.f32 %v499_v61 }
 0x248   :  { %v3030_v2 = vpop.eup %3029 }
 0x249   :  { %v579_v4 = vmul.f32 %v3030_v2, %v576_v63 }
 0x24b   :  { %v580_v7 = vadd.f32 %v579_v4, %v351_v3 }
 0x24d   :  { %3031 = vtanh.f32 %v580_v7 }
 0x24e   :  { %3033 = vrcp.f32 %v506_v6 }
 0x257   :  { %v3032_v8 = vpop.eup %3031 }
 0x258   :  { %v582_v9 = vsub.f32 %v346_v47, %v3032_v8  ;;  %v3034_v10 = vpop.eup %3033 }
 0x25a   :  { %v583_v13 = vmul.f32 %v3034_v10, %v582_v9  ;;  %v1063_v10 = vld [vmem:[#allocation4 + $0x60] sm:$0xff] }
 0x25c   :  { %v584_v14 = vadd.f32 %v3032_v8, %v583_v13 }
 0x25e   :  { %585 = vst.msk [vmem:[#allocation3 + $0x8] sm:$0xff] %vm86_vm0, %v584_v14  ;;  %2616 = vmatmul.mubr.msk.f32.vlgmr.msra.gmra.mrb[6].mxu0 %vm86_vm0, %v584_v14  ;;  %2627 = vmatmul.mubr.msk.f32.vlgmr.msra.gmra.mrb[6].mxu1 %vm86_vm0, %v584_v14 }
 0x25f   :  { %2895 = vmatpush3.bf16.msra.mxu0 %v3358_v17  ;;  %2637 = vmatprep.mubr.msk.f32.mxu0 %vm3220_vm1, %v3221_v1 }
 0x260   :  { %2896 = vmatprep.subr.bf16.mxu0 %v3219_v0  ;;  %2901 = vmatpush3.bf16.msra.mxu1 %v3345_v5 }
 0x261   :  { %2902 = vmatprep.subr.bf16.mxu1 %v3219_v0  ;;  %2648 = vmatprep.mubr.msk.f32.mxu1 %vm3220_vm1, %v3221_v1 }
 0x263   :  { %2898 = vmatpush3.bf16.msra.mxu0 %v3365_v20 }
 0x264   :  { %2905 = vmatprep.subr.bf16.mxu0 %v3219_v0  ;;  %2904 = vmatpush3.bf16.msra.mxu1 %v3348_v11 }
 0x265   :  { %2911 = vmatprep.subr.bf16.mxu1 %v3219_v0 }
 0x266   :  { %2638 = vmatmul.mubr.msk.f32.vlgmr.msra.gmra.mrb[8].mxu0 %vm86_vm0, %v584_v14 }
 0x267   :  { %2907 = vmatpush3.bf16.msra.mxu0 %v3350_v12  ;;  %2659 = vmatprep.mubr.msk.f32.mxu0 %vm3220_vm1, %v3221_v1 }
 0x268   :  { %2908 = vmatprep.subr.bf16.mxu0 %v3219_v0 }
 0x26b   :  { %2910 = vmatpush3.bf16.msra.mxu0 %v3354_v15 }
 0x26c   :  { %2917 = vmatprep.subr.bf16.mxu0 %v3219_v0 }
 0x331   :  { %v659_v18 = vpop.f32.mrb[6].mxu0  ;;  %v729_v19 = vpop.f32.mrb[6].mxu1 }
 0x332   :  { %v733_v21 = vadd.f32 %v659_v18, %v587_v16  ;;  %v2617_v22 = vpop.f32.mrb[7].mxu0  ;;  %v2628_v23 = vpop.f32.mrb[7].mxu1  ;;  %v740_v27 = vadd.f32 %v729_v19, %v588_v25 }
 0x333   :  { %v1064_v22 = vld [vmem:[#allocation4 + $0x68] sm:$0xff] }
 0x334   :  { %v2351_v24 = vmul.f32 -1.442695, %v733_v21  ;;  %v2352_v29 = vmul.f32 -1.442695, %v740_v27 }
 0x336   :  { %3035 = vpow2.f32 %v2351_v24 }
 0x337   :  { %3037 = vpow2.f32 %v2352_v29 }
 0x339   :  { %v813_v26 = vpop.f32.mrb[8].mxu0 }
 0x33a   :  { %v2639_v28 = vpop.f32.mrb[9].mxu0  ;;  %v814_v33 = vadd.f32 %v3389_v35, %v813_v26 }
 0x340   :  { %v3036_v30 = vpop.eup %3035 }
 0x341   :  { %v737_v31 = vadd.f32 1.0, %v3036_v30  ;;  %v3038_v32 = vpop.eup %3037 }
 0x342   :  { %v744_v38 = vadd.f32 1.0, %v3038_v32  ;;  %v1065_v32 = vld [vmem:[#allocation4 + $0x70] sm:$0xff] }
 0x343   :  { %3039 = vrcp.f32 %v737_v31 }
 0x34d   :  { %v3040_v34 = vpop.eup %3039 }
 0x34e   :  { %v817_v37 = vmul.f32 %v3040_v34, %v814_v33 }
 0x350   :  { %v818_v39 = vadd.f32 %v817_v37, %v589_v36 }
 0x352   :  { %3041 = vtanh.f32 %v818_v39 }
 0x353   :  { %3043 = vrcp.f32 %v744_v38 }
 0x35c   :  { %v3042_v40 = vpop.eup %3041 }
 0x35d   :  { %v820_v41 = vsub.f32 %v584_v14, %v3042_v40  ;;  %v3044_v42 = vpop.eup %3043 }
 0x35f   :  { %v821_v43 = vmul.f32 %v3044_v42, %v820_v41  ;;  %v1301_v42 = vld [vmem:[#allocation4 + $0x78] sm:$0xff] }
 0x361   :  { %v822_v44 = vadd.f32 %v3042_v40, %v821_v43 }
 0x363   :  { %823 = vst.msk [vmem:[#allocation3 + $0x10] sm:$0xff] %vm86_vm0, %v822_v44  ;;  %2649 = vmatmul.mubr.msk.f32.vlgmr.msra.gmra.mrb[8].mxu1 %vm86_vm0, %v822_v44  ;;  %2660 = vmatmul.mubr.msk.f32.vlgmr.msra.gmra.mrb[10].mxu0 %vm86_vm0, %v822_v44 }
 0x364   :  { %2913 = vmatpush3.bf16.msra.mxu1 %v3358_v17  ;;  %2670 = vmatprep.mubr.msk.f32.mxu1 %vm3220_vm1, %v3221_v1 }
 0x365   :  { %2914 = vmatprep.subr.bf16.mxu1 %v3219_v0  ;;  %2919 = vmatpush3.bf16.msra.mxu0 %v3345_v5 }
 0x366   :  { %2920 = vmatprep.subr.bf16.mxu0 %v3219_v0  ;;  %2681 = vmatprep.mubr.msk.f32.mxu0 %vm3220_vm1, %v3221_v1 }
 0x368   :  { %2916 = vmatpush3.bf16.msra.mxu1 %v3365_v20 }
 0x369   :  { %2923 = vmatprep.subr.bf16.mxu1 %v3219_v0  ;;  %2922 = vmatpush3.bf16.msra.mxu0 %v3348_v11 }
 0x36a   :  { %2929 = vmatprep.subr.bf16.mxu0 %v3219_v0 }
 0x36b   :  { %2671 = vmatmul.mubr.msk.f32.vlgmr.msra.gmra.mrb[10].mxu1 %vm86_vm0, %v822_v44 }
 0x36c   :  { %2925 = vmatpush3.bf16.msra.mxu1 %v3350_v12  ;;  %2692 = vmatprep.mubr.msk.f32.mxu1 %vm3220_vm1, %v3221_v1 }
 0x36d   :  { %2926 = vmatprep.subr.bf16.mxu1 %v3219_v0 }
 0x370   :  { %2928 = vmatpush3.bf16.msra.mxu1 %v3354_v15 }
 0x371   :  { %2935 = vmatprep.subr.bf16.mxu1 %v3219_v0 }
 0x436   :  { %v897_v46 = vpop.f32.mrb[8].mxu1  ;;  %v967_v47 = vpop.f32.mrb[10].mxu0 }
 0x437   :  { %v971_v48 = vadd.f32 %v897_v46, %v825_v45  ;;  %v2650_v49 = vpop.f32.mrb[9].mxu1  ;;  %v2661_v50 = vpop.f32.mrb[11].mxu0  ;;  %v978_v54 = vadd.f32 %v967_v47, %v826_v52 }
 0x438   :  { %v1302_v49 = vld [vmem:[#allocation4 + $0x80] sm:$0xff] }
 0x439   :  { %v2356_v51 = vmul.f32 -1.442695, %v971_v48  ;;  %v2357_v56 = vmul.f32 -1.442695, %v978_v54 }
 0x43b   :  { %3045 = vpow2.f32 %v2356_v51 }
 0x43c   :  { %3047 = vpow2.f32 %v2357_v56 }
 0x43e   :  { %v1051_v53 = vpop.f32.mrb[10].mxu1 }
 0x43f   :  { %v2672_v55 = vpop.f32.mrb[11].mxu1  ;;  %v1052_v60 = vadd.f32 %v3389_v35, %v1051_v53 }
 0x445   :  { %v3046_v57 = vpop.eup %3045 }
 0x446   :  { %v975_v58 = vadd.f32 1.0, %v3046_v57  ;;  %v3048_v59 = vpop.eup %3047 }
 0x447   :  { %v982_v2 = vadd.f32 1.0, %v3048_v59  ;;  %v1303_v59 = vld [vmem:[#allocation4 + $0x88] sm:$0xff] }
 0x448   :  { %3049 = vrcp.f32 %v975_v58 }
 0x452   :  { %v3050_v61 = vpop.eup %3049 }
 0x453   :  { %v1055_v63 = vmul.f32 %v3050_v61, %v1052_v60 }
 0x455   :  { %v1056_v3 = vadd.f32 %v1055_v63, %v827_v62 }
 0x457   :  { %3051 = vtanh.f32 %v1056_v3 }
 0x458   :  { %3053 = vrcp.f32 %v982_v2 }
 0x461   :  { %v3052_v4 = vpop.eup %3051 }
 0x462   :  { %v1058_v6 = vsub.f32 %v822_v44, %v3052_v4  ;;  %v3054_v7 = vpop.eup %3053 }
 0x464   :  { %v1059_v8 = vmul.f32 %v3054_v7, %v1058_v6  ;;  %v2024_v7 = vld [vmem:[#allocation9 + $0x8] sm:$0xff] }
 0x466   :  { %v1060_v9 = vadd.f32 %v3052_v4, %v1059_v8 }
 0x468   :  { %1061 = vst.msk [vmem:[#allocation3 + $0x18] sm:$0xff] %vm86_vm0, %v1060_v9  ;;  %2682 = vmatmul.mubr.msk.f32.vlgmr.msra.gmra.mrb[12].mxu0 %vm86_vm0, %v1060_v9  ;;  %2693 = vmatmul.mubr.msk.f32.vlgmr.msra.gmra.mrb[12].mxu1 %vm86_vm0, %v1060_v9 }
 0x469   :  { %2931 = vmatpush3.bf16.msra.mxu0 %v3358_v17  ;;  %2703 = vmatprep.mubr.msk.f32.mxu0 %vm3220_vm1, %v3221_v1 }
 0x46a   :  { %2932 = vmatprep.subr.bf16.mxu0 %v3219_v0  ;;  %2937 = vmatpush3.bf16.msra.mxu1 %v3345_v5 }
 0x46b   :  { %2938 = vmatprep.subr.bf16.mxu1 %v3219_v0  ;;  %2714 = vmatprep.mubr.msk.f32.mxu1 %vm3220_vm1, %v3221_v1 }
 0x46d   :  { %2934 = vmatpush3.bf16.msra.mxu0 %v3365_v20 }
 0x46e   :  { %2941 = vmatprep.subr.bf16.mxu0 %v3219_v0  ;;  %2940 = vmatpush3.bf16.msra.mxu1 %v3348_v11 }
 0x46f   :  { %2947 = vmatprep.subr.bf16.mxu1 %v3219_v0 }
 0x470   :  { %2704 = vmatmul.mubr.msk.f32.vlgmr.msra.gmra.mrb[14].mxu0 %vm86_vm0, %v1060_v9 }
 0x471   :  { %2943 = vmatpush3.bf16.msra.mxu0 %v3350_v12  ;;  %2725 = vmatprep.mubr.msk.f32.mxu0 %vm3220_vm1, %v3221_v1 }
 0x472   :  { %2944 = vmatprep.subr.bf16.mxu0 %v3219_v0 }
 0x475   :  { %2946 = vmatpush3.bf16.msra.mxu0 %v3354_v15 }
 0x476   :  { %2953 = vmatprep.subr.bf16.mxu0 %v3219_v0 }
 0x53b   :  { %v1135_v13 = vpop.f32.mrb[12].mxu0  ;;  %v1205_v14 = vpop.f32.mrb[12].mxu1 }
 0x53c   :  { %v1209_v16 = vadd.f32 %v1135_v13, %v1063_v10  ;;  %v2683_v18 = vpop.f32.mrb[13].mxu0  ;;  %v2694_v19 = vpop.f32.mrb[13].mxu1  ;;  %v1216_v24 = vadd.f32 %v1205_v14, %v1064_v22 }
 0x53e   :  { %v2361_v21 = vmul.f32 -1.442695, %v1209_v16  ;;  %v2362_v26 = vmul.f32 -1.442695, %v1216_v24 }
 0x540   :  { %3055 = vpow2.f32 %v2361_v21 }
 0x541   :  { %3057 = vpow2.f32 %v2362_v26 }
 0x543   :  { %v1289_v23 = vpop.f32.mrb[14].mxu0 }
 0x544   :  { %v2705_v25 = vpop.f32.mrb[15].mxu0  ;;  %v1290_v30 = vadd.f32 %v3389_v35, %v1289_v23 }
 0x54a   :  { %v3056_v27 = vpop.eup %3055 }
 0x54b   :  { %v1213_v28 = vadd.f32 1.0, %v3056_v27  ;;  %v3058_v29 = vpop.eup %3057 }
 0x54c   :  { %v1220_v34 = vadd.f32 1.0, %v3058_v29 }
 0x54d   :  { %3059 = vrcp.f32 %v1213_v28  ;;  %v1541_v28 = vld [vmem:[#allocation4 + $0xa0] sm:$0xff] }
 0x557   :  { %v3060_v31 = vpop.eup %3059 }
 0x558   :  { %v1293_v33 = vmul.f32 %v3060_v31, %v1290_v30 }
 0x55a   :  { %v1294_v36 = vadd.f32 %v1293_v33, %v1065_v32 }
 0x55c   :  { %3061 = vtanh.f32 %v1294_v36 }
 0x55d   :  { %3063 = vrcp.f32 %v1220_v34 }
 0x566   :  { %v3062_v37 = vpop.eup %3061 }
 0x567   :  { %v1296_v38 = vsub.f32 %v1060_v9, %v3062_v37  ;;  %v3064_v39 = vpop.eup %3063  ;;  %v1539_v9 = vld [vmem:[#allocation4 + $0x90] sm:$0xff] }
 0x569   :  { %v1297_v40 = vmul.f32 %v3064_v39, %v1296_v38  ;;  %v2026_v38 = vld [vmem:[#allocation9 + $0x18] sm:$0xff] }
 0x56b   :  { %v1298_v41 = vadd.f32 %v3062_v37, %v1297_v40  ;;  %v2025_v37 = vld [vmem:[#allocation9 + $0x10] sm:$0xff] }
 0x56c   :  { %v2993_v40 = vpack.c.bf16 %v2026_v38, %v2025_v37 }
 0x56d   :  { %1299 = vst.msk [vmem:[#allocation3 + $0x20] sm:$0xff] %vm86_vm0, %v1298_v41  ;;  %2715 = vmatmul.mubr.msk.f32.vlgmr.msra.gmra.mrb[14].mxu1 %vm86_vm0, %v1298_v41  ;;  %2726 = vmatmul.mubr.msk.f32.vlgmr.msra.gmra.mrb[16].mxu0 %vm86_vm0, %v1298_v41 }
 0x56e   :  { %2949 = vmatpush3.bf16.msra.mxu1 %v3358_v17  ;;  %2736 = vmatprep.mubr.msk.f32.mxu1 %vm3220_vm1, %v3221_v1 }
 0x56f   :  { %2950 = vmatprep.subr.bf16.mxu1 %v3219_v0  ;;  %2955 = vmatpush3.bf16.msra.mxu0 %v3345_v5 }
 0x570   :  { %2956 = vmatprep.subr.bf16.mxu0 %v3219_v0  ;;  %2747 = vmatprep.mubr.msk.f32.mxu0 %vm3220_vm1, %v3221_v1 }
 0x572   :  { %2952 = vmatpush3.bf16.msra.mxu1 %v3365_v20 }
 0x573   :  { %2959 = vmatprep.subr.bf16.mxu1 %v3219_v0  ;;  %2958 = vmatpush3.bf16.msra.mxu0 %v3348_v11 }
 0x574   :  { %2965 = vmatprep.subr.bf16.mxu0 %v3219_v0 }
 0x575   :  { %2737 = vmatmul.mubr.msk.f32.vlgmr.msra.gmra.mrb[16].mxu1 %vm86_vm0, %v1298_v41 }
 0x576   :  { %2961 = vmatpush3.bf16.msra.mxu1 %v3350_v12  ;;  %2758 = vmatprep.mubr.msk.f32.mxu1 %vm3220_vm1, %v3221_v1 }
 0x577   :  { %2962 = vmatprep.subr.bf16.mxu1 %v3219_v0 }
 0x57a   :  { %2964 = vmatpush3.bf16.msra.mxu1 %v3354_v15 }
 0x57b   :  { %2971 = vmatprep.subr.bf16.mxu1 %v3219_v0 }
 0x640   :  { %v1373_v43 = vpop.f32.mrb[14].mxu1  ;;  %v1443_v44 = vpop.f32.mrb[16].mxu0 }
 0x641   :  { %v1447_v45 = vadd.f32 %v1373_v43, %v1301_v42  ;;  %v2716_v46 = vpop.f32.mrb[15].mxu1  ;;  %v2727_v47 = vpop.f32.mrb[17].mxu0  ;;  %v1454_v51 = vadd.f32 %v1443_v44, %v1302_v49  ;;  %v2016_v42 = vld [vmem:[#allocation3 + $0x8] sm:$0xff]  ;;  %v2018_v43 = vld [vmem:[#allocation3 + $0x18] sm:$0xff] }
 0x642   :  { %v2173_v47 = vld [vmem:[#allocation10 + $0x10] sm:$0xff] }
 0x643   :  { %v2366_v48 = vmul.f32 -1.442695, %v1447_v45  ;;  %v2367_v53 = vmul.f32 -1.442695, %v1454_v51  ;;  %v2172_v45 = vld [vmem:[#allocation10 + $0x8] sm:$0xff] }
 0x645   :  { %3065 = vpow2.f32 %v2366_v48  ;;  %v2174_v48 = vld [vmem:[#allocation10 + $0x18] sm:$0xff] }
 0x646   :  { %3067 = vpow2.f32 %v2367_v53  ;;  %v3001_v49 = vpack.c.bf16 %v2174_v48, %v2173_v47 }
 0x648   :  { %v1527_v50 = vpop.f32.mrb[16].mxu1 }
 0x649   :  { %v2738_v52 = vpop.f32.mrb[17].mxu1  ;;  %v1528_v57 = vadd.f32 %v3389_v35, %v1527_v50  ;;  %v1777_v50 = vld [vmem:[#allocation4 + $0xa8] sm:$0xff] }
 0x64f   :  { %v3066_v54 = vpop.eup %3065 }
 0x650   :  { %v1451_v55 = vadd.f32 1.0, %v3066_v54  ;;  %v3068_v56 = vpop.eup %3067 }
 0x651   :  { %v1458_v61 = vadd.f32 1.0, %v3068_v56 }
 0x652   :  { %3069 = vrcp.f32 %v1451_v55 }
 0x65c   :  { %v3070_v58 = vpop.eup %3069 }
 0x65d   :  { %v1531_v60 = vmul.f32 %v3070_v58, %v1528_v57  ;;  %v1778_v57 = vld [vmem:[#allocation4 + $0xb0] sm:$0xff]  ;;  %v3554_v58 = vld [vmem:[%s3599_s4] ss:$0 sm:$0xff] }
 0x65f   :  { %v1532_v62 = vadd.f32 %v1531_v60, %v1303_v59 }
 0x661   :  { %3071 = vtanh.f32 %v1532_v62 }
 0x662   :  { %3073 = vrcp.f32 %v1458_v61 }
 0x66b   :  { %v3072_v63 = vpop.eup %3071 }
 0x66c   :  { %v1534_v2 = vsub.f32 %v1298_v41, %v3072_v63  ;;  %v3074_v3 = vpop.eup %3073  ;;  %v2015_v41 = vld [vmem:[#allocation3] sm:$0xff] }
 0x66e   :  { %v1535_v4 = vmul.f32 %v3074_v3, %v1534_v2 }
 0x670   :  { %v1536_v6 = vadd.f32 %v3072_v63, %v1535_v4 }
 0x672   :  { %1537 = vst.msk [vmem:[#allocation3 + $0x28] sm:$0xff] %vm86_vm0, %v1536_v6  ;;  %2748 = vmatmul.mubr.msk.f32.vlgmr.msra.gmra.mrb[18].mxu0 %vm86_vm0, %v1536_v6  ;;  %2759 = vmatmul.mubr.msk.f32.vlgmr.msra.gmra.mrb[18].mxu1 %vm86_vm0, %v1536_v6 }
 0x673   :  { %2967 = vmatpush3.bf16.msra.mxu0 %v3358_v17  ;;  %2769 = vmatprep.mubr.msk.f32.mxu0 %vm3220_vm1, %v3221_v1 }
 0x674   :  { %2968 = vmatprep.subr.bf16.mxu0 %v3219_v0  ;;  %2973 = vmatpush3.bf16.msra.mxu1 %v3345_v5  ;;  %v2023_v5 = vld [vmem:[#allocation9] sm:$0xff] }
 0x675   :  { %2974 = vmatprep.subr.bf16.mxu1 %v3219_v0  ;;  %2780 = vmatprep.mubr.msk.f32.mxu1 %vm3220_vm1, %v3221_v1  ;;  %v2989_v8 = vpack.c.bf16 %v2024_v7, %v2023_v5 }
 0x677   :  { %2970 = vmatpush3.bf16.msra.mxu0 %v3365_v20 }
 0x678   :  { %2977 = vmatprep.subr.bf16.mxu0 %v3219_v0  ;;  %2976 = vmatpush3.bf16.msra.mxu1 %v3348_v11 }
 0x679   :  { %2983 = vmatprep.subr.bf16.mxu1 %v3219_v0  ;;  %v2020_v44 = vld [vmem:[#allocation3 + $0x28] sm:$0xff] }
 0x67a   :  { %2770 = vmatmul.mubr.msk.f32.vlgmr.msra.gmra.mrb[20].mxu0 %vm86_vm0, %v1536_v6 }
 0x67b   :  { %2979 = vmatpush3.bf16.msra.mxu0 %v3350_v12  ;;  %2791 = vmatprep.mubr.msk.f32.mxu0 %vm3220_vm1, %v3221_v1  ;;  %v1540_v12 = vld [vmem:[#allocation4 + $0x98] sm:$0xff] }
 0x67c   :  { %2980 = vmatprep.subr.bf16.mxu0 %v3219_v0 }
 0x67f   :  { %2982 = vmatpush3.bf16.msra.mxu0 %v3354_v15 }
 0x680   :  { %2990 = vmatprep.subr.bf16.mxu0 %v2989_v8 }
 0x745   :  { %v1611_v10 = vpop.f32.mrb[18].mxu0  ;;  %v1681_v11 = vpop.f32.mrb[18].mxu1 }
 0x746   :  { %v1685_v13 = vadd.f32 %v1611_v10, %v1539_v9  ;;  %v2749_v14 = vpop.f32.mrb[19].mxu0  ;;  %v2760_v16 = vpop.f32.mrb[19].mxu1  ;;  %v1692_v21 = vadd.f32 %v1681_v11, %v1540_v12 }
 0x748   :  { %v2371_v18 = vmul.f32 -1.442695, %v1685_v13  ;;  %v2372_v23 = vmul.f32 -1.442695, %v1692_v21 }
 0x74a   :  { %3075 = vpow2.f32 %v2371_v18 }
 0x74b   :  { %3077 = vpow2.f32 %v2372_v23 }
 0x74d   :  { %v1765_v19 = vpop.f32.mrb[20].mxu0 }
 0x74e   :  { %v2771_v22 = vpop.f32.mrb[21].mxu0  ;;  %v1766_v26 = vadd.f32 %v3389_v35, %v1765_v19 }
 0x754   :  { %v3076_v24 = vpop.eup %3075 }
 0x755   :  { %v1689_v25 = vadd.f32 1.0, %v3076_v24  ;;  %v3078_v15 = vpop.eup %3077 }
 0x756   :  { %v1696_v30 = vadd.f32 1.0, %v3078_v15 }
 0x757   :  { %3079 = vrcp.f32 %v1689_v25 }
 0x761   :  { %v3080_v27 = vpop.eup %3079 }
 0x762   :  { %v1769_v29 = vmul.f32 %v3080_v27, %v1766_v26  ;;  %v1779_v26 = vld [vmem:[#allocation4 + $0xb8] sm:$0xff] }
 0x764   :  { %v1770_v31 = vadd.f32 %v1769_v29, %v1541_v28 }
 0x766   :  { %3081 = vtanh.f32 %v1770_v31 }
 0x767   :  { %3083 = vrcp.f32 %v1696_v30 }
 0x770   :  { %v3082_v32 = vpop.eup %3081 }
 0x771   :  { %v1772_v33 = vsub.f32 %v1536_v6, %v3082_v32  ;;  %v3084_v34 = vpop.eup %3083 }
 0x773   :  { %v1773_v36 = vmul.f32 %v3084_v34, %v1772_v33 }
 0x775   :  { %v3529_v39 = vadd.f32 %v3082_v32, %v1773_v36 }
 0x777   :  { %1775 = vst.msk [vmem:[#allocation3 + $0x30] sm:$0xff] %vm86_vm0, %v3529_v39  ;;  %2781 = vmatmul.mubr.msk.f32.vlgmr.msra.gmra.mrb[20].mxu1 %vm86_vm0, %v3529_v39  ;;  %2792 = vmatmul.mubr.msk.f32.vlgmr.msra.gmra.mrb[22].mxu0 %vm86_vm0, %v3529_v39 }
 0x778   :  { %2985 = vmatpush3.bf16.msra.mxu1 %v3358_v17  ;;  %2992 = vmatpush3.bf16.msra.mxu0 %v2989_v8  ;;  %v2017_v17 = vld [vmem:[#allocation3 + $0x10] sm:$0xff] }
 0x779   :  { %2813 = vmatprep.mubr.msk.f32.mxu0 %vm86_vm0, %v2015_v41  ;;  %2986 = vmatprep.subr.bf16.mxu1 %v3219_v0  ;;  %v2019_v0 = vld [vmem:[#allocation3 + $0x20] sm:$0xff] }
 0x77a   :  { %2994 = vmatprep.subr.bf16.mxu0 %v2993_v40  ;;  %2802 = vmatprep.mubr.msk.f32.mxu1 %vm3220_vm1, %v3221_v1 }
 0x77c   :  { %2988 = vmatpush3.bf16.msra.mxu1 %v3365_v20  ;;  %2996 = vmatpush3.bf16.msra.mxu0 %v2993_v40  ;;  %v2171_v20 = vld [vmem:[#allocation10] sm:$0xff] }
 0x77d   :  { %v2997_v46 = vpack.c.bf16 %v2172_v45, %v2171_v20 }
 0x77e   :  { %v2021_v1 = vld [vmem:[#allocation3 + $0x30] sm:$0xff] }
 0x77f   :  { %2803 = vmatmul.mubr.msk.f32.vlgmr.msra.gmra.mrb[22].mxu1 %vm86_vm0, %v3529_v39  ;;  %2814 = vmatmul.mubr.msk.f32.vlgmr.msra.gmra.mrb[24].mxu0 %vm86_vm0, %v2016_v42 }
 0x780   :  { %2816 = vmatprep.mubr.msk.f32.mxu0 %vm86_vm0, %v2017_v17  ;;  %2998 = vmatprep.subr.bf16.mxu1 %v2997_v46 }
 0x781   :  { %3000 = vmatpush3.bf16.msra.mxu1 %v2997_v46 }
 0x782   :  { %3002 = vmatprep.subr.bf16.mxu1 %v3001_v49 }
 0x783   :  { %2817 = vmatmul.mubr.msk.f32.gmra.mrb[26].mxu0 %vm86_vm0, %v2018_v43 }
 0x784   :  { %2819 = vmatprep.mubr.msk.f32.mxu0 %vm86_vm0, %v2019_v0 }
 0x785   :  { %3004 = vmatpush3.bf16.msra.mxu1 %v3001_v49 }
 0x787   :  { %2820 = vmatmul.mubr.msk.f32.gmra.mrb[28].mxu0 %vm86_vm0, %v2020_v44 }
 0x788   :  { %2822 = vmatprep.mubr.msk.f32.mxu0 %vm86_vm0, %v2021_v1 }
 0x84a   :  { %v1849_v51 = vpop.f32.mrb[20].mxu1  ;;  %v1919_v52 = vpop.f32.mrb[22].mxu0 }
 0x84b   :  { %v1923_v53 = vadd.f32 %v1849_v51, %v1777_v50  ;;  %v2782_v54 = vpop.f32.mrb[21].mxu1  ;;  %v2793_v55 = vpop.f32.mrb[23].mxu0  ;;  %v1930_v61 = vadd.f32 %v1919_v52, %v1778_v57 }
 0x84d   :  { %v2376_v56 = vmul.f32 -1.442695, %v1923_v53  ;;  %v2377_v5 = vmul.f32 -1.442695, %v1930_v61 }
 0x84f   :  { %3085 = vpow2.f32 %v2376_v56 }
 0x850   :  { %3087 = vpow2.f32 %v2377_v5 }
 0x852   :  { %v2003_v59 = vpop.f32.mrb[22].mxu1  ;;  %v2815_v60 = vpop.f32.mrb[24].mxu0 }
 0x853   :  { %v2130_v62 = vadd.f32 %v2815_v60, %v3554_v58  ;;  %v2804_v63 = vpop.f32.mrb[23].mxu1  ;;  %v2124_v2 = vpop.f32.mrb[25].mxu0  ;;  %v2004_v25 = vadd.f32 %v3389_v35, %v2003_v59  ;;  %v2388_v35 = vld [vmem:[%s3601_s6] ss:$0 sm:$0xff]  ;;  %s3222_s6 = smov [#allocation12]  }
 0x854   :  { %v2125_v3 = vadd.f32 %v3554_v58, %v2124_v2  ;;  %s2324_s30 = sshll.u32 %s3222_s6, 4  ;;  %s2325_s30 = int_to_ptr.vmem [resolvable:$true] %s2324_s30 }
 0x855   :  { %v2164_v7 = vmax.f32 %v2130_v62, 0.0  ;;  %s3183_s8 = scalar_lea.vmem %s2325_s30, 1024  ;;  %p3188_p5 = scmp.lt.s32.totalorder %s2325_s30, %s2325_s30 }
 0x856   :  { %v2163_v4 = vmax.f32 %v2125_v3, 0.0  ;;  %v2818_v6 = vpop.f32.mrb[26].mxu0  ;;  %p3184_p4 = scmp.ne.s32.totalorder %s2325_s30, %s3183_s8  ;;  %p3189_p6 = scmp.lt.s32.totalorder %s3183_s8, %s3183_s8 }
 0x857   :  { %v2140_v8 = vadd.f32 %v2818_v6, %v3554_v58  ;;  %v2134_v9 = vpop.f32.mrb[27].mxu0 }
 0x858   :  { %v2135_v10 = vadd.f32 %v3554_v58, %v2134_v9  ;;  %2833 = vmatprep.mubr.msk.f32.mxu1 %vm86_vm0, %v2163_v4  ;;  %p3190_p7 = por %p3189_p6, %p3188_p5 }
 0x859   :  { %v3086_v11 = vpop.eup %3085  ;;  %2834 = vmatmul.mubr.msk.f32.vlgmr.msra.gmra.mrb[24].mxu1 %vm86_vm0, %v2164_v7  ;;  %v2166_v18 = vmax.f32 %v2140_v8, 0.0 }
 0x85a   :  { %v1927_v13 = vadd.f32 1.0, %v3086_v11  ;;  %v2165_v14 = vmax.f32 %v2135_v10, 0.0  ;;  %v2821_v16 = vpop.f32.mrb[28].mxu0  ;;  %v3088_v24 = vpop.eup %3087  ;;  %p3191_p8 = pnand %p3190_p7, %p3184_p4 }
 0x85b   :  { %v2150_v12 = vadd.f32 %v2821_v16, %v3554_v58  ;;  %v2144_v19 = vpop.f32.mrb[29].mxu0  ;;  %v1934_v28 = vadd.f32 1.0, %v3088_v24 }
 0x85c   :  { %3089 = vrcp.f32 %v1927_v13  ;;  %v2145_v21 = vadd.f32 %v3554_v58, %v2144_v19  ;;  %2836 = vmatprep.mubr.msk.f32.mxu1 %vm86_vm0, %v2165_v14 }
 0x85d   :  { %2837 = vmatmul.mubr.msk.f32.gmra.mrb[26].mxu1 %vm86_vm0, %v2166_v18  ;;  %v2168_v23 = vmax.f32 %v2150_v12, 0.0 }
 0x85e   :  { %v2167_v22 = vmax.f32 %v2145_v21, 0.0 }
 0x860   :  { %2839 = vmatprep.mubr.msk.f32.mxu1 %vm86_vm0, %v2167_v22 }
 0x861   :  { %2840 = vmatmul.mubr.msk.f32.gmra.mrb[28].mxu1 %vm86_vm0, %v2168_v23 }
 0x866   :  { %v3090_v15 = vpop.eup %3089 }
 0x867   :  { %v2007_v27 = vmul.f32 %v3090_v15, %v2004_v25 }
 0x869   :  { %v2008_v29 = vadd.f32 %v2007_v27, %v1779_v26 }
 0x86b   :  { %3091 = vtanh.f32 %v2008_v29 }
 0x86c   :  { %3093 = vrcp.f32 %v1934_v28 }
 0x875   :  { %v3092_v30 = vpop.eup %3091 }
 0x876   :  { %v2010_v31 = vsub.f32 %v3529_v39, %v3092_v30  ;;  %v3094_v32 = vpop.eup %3093 }
 0x878   :  { %v2011_v33 = vmul.f32 %v3094_v32, %v2010_v31 }
 0x87a   :  { %v2012_v34 = vadd.f32 %v3092_v30, %v2011_v33 }
 0x87c   :  { %2013 = vst.msk [vmem:[#allocation3 + $0x38] sm:$0xff] %vm86_vm0, %v2012_v34  ;;  %2014 = vst.msk [vmem:[#allocation2] sm:$0xff] %vm86_vm0, %v2012_v34 }
 0x883   :  { %v2022_v36 = vld [vmem:[#allocation3 + $0x38] sm:$0xff] }
 0x884   :  { %2823 = vmatmul.mubr.msk.f32.gmra.mrb[30].mxu0 %vm86_vm0, %v2022_v36 }
 0x92c   :  { %v2835_v37 = vpop.f32.mrb[24].mxu1 }
 0x92d   :  { %v2278_v38 = vadd.f32 %v2835_v37, %v2388_v35  ;;  %v2272_v40 = vpop.f32.mrb[25].mxu1 }
 0x92e   :  { %v2273_v41 = vadd.f32 %v2388_v35, %v2272_v40 }
 0x92f   :  { %2312 = vst [vmem:[#allocation12 + $0x8] sm:$0xff] %v2278_v38 }
 0x930   :  { %2311 = vst [vmem:[#allocation12] sm:$0xff] %v2273_v41  ;;  %v2838_v39 = vpop.f32.mrb[26].mxu1 }
 0x931   :  { %v2288_v42 = vadd.f32 %v2838_v39, %v2388_v35  ;;  %v2282_v17 = vpop.f32.mrb[27].mxu1 }
 0x932   :  { %v2283_v43 = vadd.f32 %v2388_v35, %v2282_v17 }
 0x933   :  { %2314 = vst [vmem:[#allocation12 + $0x18] sm:$0xff] %v2288_v42 }
 0x934   :  { %2313 = vst [vmem:[#allocation12 + $0x10] sm:$0xff] %v2283_v43  ;;  %v2841_v0 = vpop.f32.mrb[28].mxu1 }
 0x935   :  { %v2298_v44 = vadd.f32 %v2841_v0, %v2388_v35  ;;  %v2292_v1 = vpop.f32.mrb[29].mxu1 }
 0x936   :  { %v2293_v20 = vadd.f32 %v2388_v35, %v2292_v1 }
 0x937   :  { %2316 = vst [vmem:[#allocation12 + $0x28] sm:$0xff] %v2298_v44 }
 0x938   :  { %2315 = vst [vmem:[#allocation12 + $0x20] sm:$0xff] %v2293_v20 }
 0x957   :  { %v2824_v45 = vpop.f32.mrb[30].mxu0 }
 0x958   :  { %v2160_v46 = vadd.f32 %v2824_v45, %v3554_v58  ;;  %v2154_v47 = vpop.f32.mrb[31].mxu0 }
 0x959   :  { %v2155_v48 = vadd.f32 %v3554_v58, %v2154_v47 }
 0x95a   :  { %v2170_v50 = vmax.f32 %v2160_v46, 0.0 }
 0x95b   :  { %v2169_v49 = vmax.f32 %v2155_v48, 0.0 }
 0x95d   :  { %2842 = vmatprep.mubr.msk.f32.mxu1 %vm86_vm0, %v2169_v49 }
 0x95e   :  { %2843 = vmatmul.mubr.msk.f32.gmra.mrb[30].mxu1 %vm86_vm0, %v2170_v50 }
 0xa31   :  { %v2844_v51 = vpop.f32.mrb[30].mxu1 }
 0xa32   :  { %v2308_v52 = vadd.f32 %v2844_v51, %v2388_v35  ;;  %v2302_v53 = vpop.f32.mrb[31].mxu1 }
 0xa33   :  { %v2303_v54 = vadd.f32 %v2388_v35, %v2302_v53 }
 0xa34   :  { %2318 = vst [vmem:[#allocation12 + $0x38] sm:$0xff] %v2308_v52 }
 0xa35   :  { %2317 = vst [vmem:[#allocation12 + $0x30] sm:$0xff] %v2303_v54 }
 0xa36   :  { %3194 = shalt.err (!%p3191_p8)
}
 0xa37   :  { %s3195_s11 = scalar_lea.hbm %s3602_s7, 1024 }
 0xa38   :  { %p3196_p9 = scmp.ne.s32.totalorder %s3602_s7, %s3195_s11  ;;  %p3199_p10 = scmp.lt.u32.totalorder %s3195_s11, %s3602_s7 }
 0xa3a   :  { %p3201_p11 = pnand %p3199_p10, %p3196_p9 }
 0xa3c   :  { %3204 = shalt.err (!%p3201_p11)
}
 0xa3d   :  { %2330 = dma.vmem_to_hbm [thread:$0]  %s2325_s30, 1024, %s3602_s7, [#allocation6], %s3215_s13, %s3215_s13, %s3216_s14  }
 0xa3e   :  { %3211 = dma.done.wait [#allocation6], 1024  }
 0xa3f   :  { %3212 = vsyncadd [#allocation6], 4294966272 }
 0xa40   :  { %2334 = vsyncpa [#allocation5], 1 }
 0xa41   :  { %2335 = vsyncpa [#allocation8], 1 }
 0xa42   :  { %2336 = vsyncpa [#allocation11], 1 }
 0xa43   :  { %2337 = vsyncpa [#allocation6], 1 }

</bundles_post_ra>
